<compile_context>
chip_gen: v7x
topology: tpu7x:2x2x1
jax: 0.10.0
libtpu: 0.0.40
codegen_flags: <defaults>
</compile_context>

<pallas_src>
import functools
import math

import jax
import jax.numpy as jnp
from jax.experimental import pallas as pl
from jax.experimental.pallas import tpu as pltpu


# ------------------------------------------------------------------ config --
class Args:
    state_shape = (32,)        # state_dim = 32
    hypernet_embed = 64
    n_agents = 4
    rnn_hidden_dim = 32
    att_heads = 2
    att_embed_dim = 16
    coach_hidden_dim = 32      # dh
    n_strategy = 3             # ds


_LANES = 128    # lane width of the packed weight / bias / output slabs
_MAX_TB = 32    # max team states per grid step (na * 32 = 128 agent rows)


def _round_up(x, m):
    return ((x + m - 1) // m) * m


# ----------------------------------------------------------- static layout --
def _layout(args):
    """Static packing layout shared by the host-side packer and the kernel."""
    sd = math.prod(args.state_shape)
    hyp = args.hypernet_embed
    na, rnn = args.n_agents, args.rnn_hidden_dim
    heads, embed = args.att_heads, args.att_embed_dim
    he = heads * embed
    dh, ds = args.coach_hidden_dim, args.n_strategy

    assert max(hyp, na * rnn, 3 * he, dh, ds * dh) <= _LANES
    assert 3 * dh <= _LANES and ds * dh <= _LANES

    wsegs = [("w1", sd, hyp), ("w2", hyp, na * rnn), ("wqkv", rnn, 3 * he),
             ("wfc2", he, dh), ("ws", dh, dh), ("wm", dh, ds * dh),
             ("wl", dh, ds * dh), ("ww", dh, ds * dh)]
    w, off = {}, 0
    for name, r, c in wsegs:
        w[name] = (off, r, c)
        off += _round_up(r, 16)            # keep bf16 (16,128) tile alignment
    wrows = _round_up(off, 16)

    bsegs = [("b1", hyp), ("b2", na * rnn), ("bfc2", dh), ("bs", dh),
             ("bm", ds * dh), ("bl", ds * dh), ("bw", ds * dh)]
    b = {name: (i, c) for i, (name, c) in enumerate(bsegs)}
    brows = _round_up(len(bsegs), 8)

    return dict(w=w, wrows=wrows, b=b, brows=brows, gw=_LANES,
                sd=sd, hyp=hyp, na=na, rnn=rnn, heads=heads, embed=embed,
                he=he, dh=dh, ds=ds)


# ------------------------------------------------------------- fused kernel --
def _coach_kernel(state_ref, w_ref, b_ref, eps_ref, out_ref, *, lay, tb):
    bf16, f32 = jnp.bfloat16, jnp.float32
    na, rnn = lay["na"], lay["rnn"]
    heads, embed, he = lay["heads"], lay["embed"], lay["he"]
    dh, ds, gw = lay["dh"], lay["ds"], lay["gw"]
    nr = na * tb                                           # agent rows per tile

    def wld(name):
        r0, r, c = lay["w"][name]
        return w_ref[r0:r0 + r, 0:c]                       # bf16 (r, c)

    def bld(name):
        r, c = lay["b"][name]
        return b_ref[r:r + 1, 0:c]                         # f32 (1, c)

    def mm(x, w):
        return jnp.dot(x, w, preferred_element_type=f32)   # bf16 x bf16 -> f32

    # ---- fc1: Linear -> ReLU -> Linear on the tb UNIQUE team states --------
    st = state_ref[...].astype(bf16)                               # (tb, sd)
    h1 = jnp.maximum(mm(st, wld("w1")) + bld("b1"), 0.0)           # (tb, hyp)
    xw = mm(h1.astype(bf16), wld("w2")) + bld("b2")                # (tb, na*rnn)

    # split per-agent rnn blocks into flat agent rows (agent-major in tile)
    x_r = jnp.concatenate([xw[:, a * rnn:(a + 1) * rnn] for a in range(na)],
                          axis=0)                                  # (nr, rnn)
    xb = x_r.astype(bf16)

    # ---- multi-head self-attention over the agents of each team state ------
    qkv = mm(xb, wld("wqkv"))                                      # (nr, 3*he)
    rloc = jax.lax.broadcasted_iota(jnp.int32, (nr, nr), 0) % tb
    cloc = jax.lax.broadcasted_iota(jnp.int32, (nr, nr), 1) % tb
    same = rloc == cloc                                            # same team state
    inv_sqrt_e = float(embed) ** -0.5

    heads_out = []
    for hd in range(heads):
        qh = qkv[:, hd * embed:(hd + 1) * embed].astype(bf16)
        kh = qkv[:, he + hd * embed:he + (hd + 1) * embed].astype(bf16)
        vh = qkv[:, 2 * he + hd * embed:2 * he + (hd + 1) * embed].astype(bf16)
        # NT matmul: contract on the last dims, no in-kernel transpose of kh
        sc = jax.lax.dot_general(qh, kh, (((1,), (1,)), ((), ())),
                                 preferred_element_type=f32) * inv_sqrt_e
        sc = jnp.where(same, sc, -1e30)
        m = jnp.max(sc, axis=-1, keepdims=True)
        e = jnp.exp(sc - m)
        p = e * pl.reciprocal(jnp.sum(e, axis=-1, keepdims=True), approx=True)
        heads_out.append(mm(p.astype(bf16), vh))                   # (nr, embed)
    att = jnp.concatenate(heads_out, axis=-1)                      # (nr, he)

    h = jnp.maximum(mm(att.astype(bf16), wld("wfc2")) + bld("bfc2"), 0.0)  # (nr, dh)

    # ---- strategy heads (mean / logvar / mixture weights) -------------------
    shared = mm(h.astype(bf16), wld("ws")) + bld("bs")             # (nr, dh)
    sb = shared.astype(bf16)                                       # hoisted cast
    mu_flat = mm(sb, wld("wm")) + bld("bm")                        # (nr, ds*dh)
    lv_flat = jnp.clip(mm(sb, wld("wl")) + bld("bl"), -10.0, 0.0)  # (nr, ds*dh)
    lg_flat = mm(sb, wld("ww")) + bld("bw")   # strategy logit replicated per dh block

    # softmax over strategies — element-wise thanks to lane-replicated logits
    lg = [lg_flat[:, s * dh:(s + 1) * dh] for s in range(ds)]
    mx = lg[0]
    for s in range(1, ds):
        mx = jnp.maximum(mx, lg[s])
    ex = [jnp.exp(l - mx) for l in lg]
    den = ex[0]
    for s in range(1, ds):
        den = den + ex[s]
    inv = 1.0 / den                    # exact normalization of mixture weights

    mix_mu = jnp.zeros((nr, dh), f32)
    mix_lv = jnp.zeros((nr, dh), f32)
    for s in range(ds):
        ws_ = ex[s] * inv
        mix_mu = mix_mu + ws_ * mu_flat[:, s * dh:(s + 1) * dh]
        mix_lv = mix_lv + ws_ * lv_flat[:, s * dh:(s + 1) * dh]

    std = jnp.exp(0.5 * mix_lv)
    z = mix_mu + eps_ref[...] * std                                # (nr, dh)

    # ---- single lane-dense output slab: 3 x 128-lane groups -----------------
    pieces = [z, mix_mu, mix_lv]
    if gw - 3 * dh:
        pieces.append(jnp.zeros((nr, gw - 3 * dh), f32))
    pieces.append(mu_flat)
    if gw - ds * dh:
        pieces.append(jnp.zeros((nr, gw - ds * dh), f32))
    pieces.append(lv_flat)
    if gw - ds * dh:
        pieces.append(jnp.zeros((nr, gw - ds * dh), f32))
    out_ref[...] = jnp.concatenate(pieces, axis=-1)                # (nr, 3*gw)


# ---------------------------------------------------------- pallas wrapper --
def _fused_forward(state_p, eps_k, wslab, bslab, lay, tb):
    nt = state_p.shape[0] // tb
    nr = lay["na"] * tb
    gw, sd, dh = lay["gw"], lay["sd"], lay["dh"]
    kernel = functools.partial(_coach_kernel, lay=lay, tb=tb)
    return pl.pallas_call(
        kernel,
        out_shape=jax.ShapeDtypeStruct((nt * nr, 3 * gw), jnp.float32),
        grid=(nt,),
        in_specs=[
            pl.BlockSpec((tb, sd), lambda i: (i, 0)),                   # states
            pl.BlockSpec((lay["wrows"], _LANES), lambda i: (0, 0)),     # weight slab
            pl.BlockSpec((lay["brows"], _LANES), lambda i: (0, 0)),     # bias slab
            pl.BlockSpec((nr, dh), lambda i: (i, 0)),                   # eps
        ],
        out_specs=pl.BlockSpec((nr, 3 * gw), lambda i: (i, 0)),
        compiler_params=pltpu.CompilerParams(dimension_semantics=("parallel",)),
    )(state_p, wslab, bslab, eps_k)


def multi_strategy_coach_forward(kparams, batch_state, eps, t, args):
    """Mirrors MultiStrategyCoach.forward(batch, t); batch_state ~ batch['state']."""
    lay = _layout(args)
    na, dh, ds, gw = lay["na"], lay["dh"], lay["ds"], lay["gw"]
    B = batch_state.shape[0]
    state_t = batch_state[:, t].reshape(B, -1)                     # (B, state_dim)

    tb = min(_MAX_TB, _round_up(B, 8))                             # team states / tile
    Bp = _round_up(B, tb)
    nt = Bp // tb
    pad_b = Bp - B

    state_p = jnp.pad(state_t, ((0, pad_b), (0, 0)))
    # reparameterization noise, re-ordered to the kernel's (tile, agent, row) order
    eps_k = jnp.pad(eps.reshape(B, na, dh), ((0, pad_b), (0, 0), (0, 0)))
    eps_k = eps_k.reshape(nt, tb, na, dh).transpose(0, 2, 1, 3).reshape(nt * na * tb, dh)

    out = _fused_forward(state_p, eps_k, kparams["wslab"], kparams["bslab"], lay, tb)

    # undo the agent-major tile ordering and split the packed slab
    out = (out.reshape(nt, na, tb, 3 * gw).transpose(0, 2, 1, 3)
              .reshape(Bp, na, 3 * gw)[:B])                        # (B, na, 3*gw)
    z = out[..., 0:dh].reshape(B * na, dh)
    mix_mu = out[..., dh:2 * dh].reshape(B * na, dh)
    mix_logvar = out[..., 2 * dh:3 * dh].reshape(B * na, dh)
    mu = out[..., gw:gw + ds * dh].reshape(B * na, ds, dh)
    logvar = out[..., 2 * gw:2 * gw + ds * dh].reshape(B * na, ds, dh)
    return z, mix_mu, mix_logvar, mu, logvar


# ------------------------------------------------------------------- params --
def init_params(key, args):
    """'Module-style' params: every Linear weight stored as (in, out)."""
    sd = math.prod(args.state_shape)
    dh, ds = args.coach_hidden_dim, args.n_strategy
    na, rnn = args.n_agents, args.rnn_hidden_dim
    he = args.att_heads * args.att_embed_dim

    def w(k, din, dout):
        return jax.random.normal(k, (din, dout), jnp.float32) * 0.05

    def b(dout):
        return jnp.zeros((dout,), jnp.float32)

    ks = jax.random.split(key, 10)
    return {
        "fc1_w1": w(ks[0], sd, args.hypernet_embed), "fc1_b1": b(args.hypernet_embed),
        "fc1_w2": w(ks[1], args.hypernet_embed, na * rnn), "fc1_b2": b(na * rnn),
        "att_wq": w(ks[2], rnn, he), "att_wk": w(ks[3], rnn, he), "att_wv": w(ks[4], rnn, he),
        "fc2_w": w(ks[5], he, dh), "fc2_b": b(dh),
        "shared_w": w(ks[6], dh, dh), "shared_b": b(dh),
        "mean_w": w(ks[7], dh, ds * dh), "mean_b": b(ds * dh),
        "logvar_w": w(ks[8], dh, ds * dh), "logvar_b": b(ds * dh),
        "weights_w": w(ks[9], dh, ds), "weights_b": b(ds),
    }


def prepare_kernel_params(p, args):
    """Pack all weights into ONE bf16 slab and all biases into ONE f32 slab."""
    lay = _layout(args)
    dh = lay["dh"]

    wslab = jnp.zeros((lay["wrows"], _LANES), jnp.bfloat16)

    def putw(slab, name, mat):
        r0, r, c = lay["w"][name]
        return slab.at[r0:r0 + r, 0:c].set(mat.astype(jnp.bfloat16))

    wqkv = jnp.concatenate([p["att_wq"], p["att_wk"], p["att_wv"]], axis=1)
    # strategy-logit weights replicated across the dh lanes of each strategy block
    ww_rep = jnp.repeat(p["weights_w"], dh, axis=1)                # (dh, ds*dh)
    wslab = putw(wslab, "w1", p["fc1_w1"])
    wslab = putw(wslab, "w2", p["fc1_w2"])
    wslab = putw(wslab, "wqkv", wqkv)
    wslab = putw(wslab, "wfc2", p["fc2_w"])
    wslab = putw(wslab, "ws", p["shared_w"])
    wslab = putw(wslab, "wm", p["mean_w"])
    wslab = putw(wslab, "wl", p["logvar_w"])
    wslab = putw(wslab, "ww", ww_rep)

    bslab = jnp.zeros((lay["brows"], _LANES), jnp.float32)

    def putb(slab, name, vec):
        r, c = lay["b"][name]
        return slab.at[r, 0:c].set(vec.astype(jnp.float32))

    bslab = putb(bslab, "b1", p["fc1_b1"])
    bslab = putb(bslab, "b2", p["fc1_b2"])
    bslab = putb(bslab, "bfc2", p["fc2_b"])
    bslab = putb(bslab, "bs", p["shared_b"])
    bslab = putb(bslab, "bm", p["mean_b"])
    bslab = putb(bslab, "bl", p["logvar_b"])
    bslab = putb(bslab, "bw", jnp.repeat(p["weights_b"], dh))
    return {"wslab": wslab, "bslab": bslab}


# --------------------------------------------------------- pure-JAX reference --
def _reference_forward(p, batch_state, eps, t, args):
    B = batch_state.shape[0]
    na, rnn = args.n_agents, args.rnn_hidden_dim
    heads, embed = args.att_heads, args.att_embed_dim
    dh, ds = args.coach_hidden_dim, args.n_strategy

    s = batch_state[:, t].reshape(B, -1)
    h1 = jax.nn.relu(s @ p["fc1_w1"] + p["fc1_b1"])
    x = (h1 @ p["fc1_w2"] + p["fc1_b2"]).reshape(B, na, rnn)
    q = (x @ p["att_wq"]).reshape(B, na, heads, embed)
    k = (x @ p["att_wk"]).reshape(B, na, heads, embed)
    v = (x @ p["att_wv"]).reshape(B, na, heads, embed)
    sc = jnp.einsum("bqhe,bkhe->bhqk", q, k) / math.sqrt(embed)
    pr = jax.nn.softmax(sc, axis=-1)
    o = jnp.einsum("bhqk,bkhe->bqhe", pr, v).reshape(B, na, heads * embed)
    h = jax.nn.relu(o @ p["fc2_w"] + p["fc2_b"]).reshape(B * na, dh)
    shared = h @ p["shared_w"] + p["shared_b"]
    mu = (shared @ p["mean_w"] + p["mean_b"]).reshape(-1, ds, dh)
    logvar = jnp.clip((shared @ p["logvar_w"] + p["logvar_b"]).reshape(-1, ds, dh),
                      -10.0, 0.0)
    w = jax.nn.softmax(shared @ p["weights_w"] + p["weights_b"], axis=-1)
    mix_mu = jnp.sum(mu * w[:, :, None], axis=1)
    mix_lv = jnp.sum(logvar * w[:, :, None], axis=1)
    z = mix_mu + eps * jnp.exp(0.5 * mix_lv)
    return z, mix_mu, mix_lv, mu, logvar


# --------------------------------------------------------------------- main --
if __name__ == "__main__":
    args = Args()
    B, T, t = 2, 5, 1
    state_dim = math.prod(args.state_shape)
    na, dh, ds = args.n_agents, args.coach_hidden_dim, args.n_strategy

    key = jax.random.PRNGKey(0)
    k_param, k_state, k_eps = jax.random.split(key, 3)

    params = init_params(k_param, args)
    kparams = prepare_kernel_params(params, args)

    batch_state = jax.random.normal(k_state, (B, T, state_dim), jnp.float32)
    # reparameterization noise (torch.randn_like equivalent), supplied explicitly
    eps = jax.random.normal(k_eps, (B * na, dh), jnp.float32)

    fwd = jax.jit(functools.partial(multi_strategy_coach_forward, t=t, args=args))
    z, mix_mu, mix_logvar, mu, logvar = fwd(kparams, batch_state, eps)
    jax.block_until_ready((z, mix_mu, mix_logvar, mu, logvar))

    assert z.shape == (B * na, dh)
    assert mix_mu.shape == (B * na, dh)
    assert mix_logvar.shape == (B * na, dh)
    assert mu.shape == (B * na, ds, dh)
    assert logvar.shape == (B * na, ds, dh)
    assert bool(jnp.isfinite(z).all()) and bool(jnp.isfinite(mu).all())

    # pure-JAX f32 reference (kernel uses bf16 MXU -> loose tolerance)
    rz, rmm, rml, rmu, rlv = _reference_forward(params, batch_state, eps, t, args)
    for got, ref in ((z, rz), (mix_mu, rmm), (mix_logvar, rml), (mu, rmu), (logvar, rlv)):
        assert bool(jnp.allclose(got, ref, rtol=5e-2, atol=5e-3)), "mismatch vs reference"

    print("KERNEL_OK")
</pallas_src>

<mosaic_0001>
module attributes {stable_mosaic.version = 11 : i64} {
  func.func @_coach_kernel(%arg0: i32, %arg1: memref<8x32xf32, #tpu.memory_space<vmem>>, %arg2: memref<288x128xbf16, #tpu.memory_space<vmem>>, %arg3: memref<8x128xf32, #tpu.memory_space<vmem>>, %arg4: memref<32x32xf32, #tpu.memory_space<vmem>>, %arg5: memref<32x384xf32, #tpu.memory_space<vmem>>) attributes {dimension_semantics = [#tpu.dimension_semantics<parallel>], iteration_bounds = array<i64: 1>, scalar_prefetch = 0 : i64, scratch_operands = 0 : i64, tpu.core_type = #tpu.core_type<tc>, window_params = [{transform_indices = @transform_0, window_bounds = array<i64: 8, 32>}, {pipeline_mode = #tpu.pipeline_mode<synchronous>, transform_indices = @transform_1, window_bounds = array<i64: 288, 128>}, {pipeline_mode = #tpu.pipeline_mode<synchronous>, transform_indices = @transform_2, window_bounds = array<i64: 8, 128>}, {transform_indices = @transform_3, window_bounds = array<i64: 32, 32>}, {transform_indices = @transform_4, window_bounds = array<i64: 32, 384>}]} {
    %c0 = arith.constant 0 : index
    %c0_0 = arith.constant 0 : index
    %0 = vector.load %arg1[%c0, %c0_0] : memref<8x32xf32, #tpu.memory_space<vmem>>, vector<8x32xf32>
    %1 = arith.truncf %0 : vector<8x32xf32> to vector<8x32xbf16>
    %c0_1 = arith.constant 0 : index
    %c0_2 = arith.constant 0 : index
    %2 = vector.load %arg2[%c0_1, %c0_2] : memref<288x128xbf16, #tpu.memory_space<vmem>>, vector<32x64xbf16>
    %cst = arith.constant dense<0.000000e+00> : vector<8x64xf32>
    %3 = tpu.matmul %1, %2, %cst {dimension_numbers = #tpu.dot_dimension_numbers<[1], [0], [0], [1], [0, 0, 1, 1], [], []>} : vector<8x32xbf16>, vector<32x64xbf16>, vector<8x64xf32> -> vector<8x64xf32>
    %c0_3 = arith.constant 0 : index
    %c0_4 = arith.constant 0 : index
    %4 = vector.load %arg3[%c0_3, %c0_4] : memref<8x128xf32, #tpu.memory_space<vmem>>, vector<1x64xf32>
    %5 = vector.broadcast %4 : vector<1x64xf32> to vector<8x64xf32>
    %6 = arith.addf %3, %5 : vector<8x64xf32>
    %cst_5 = arith.constant 0.000000e+00 : f32
    %7 = vector.broadcast %cst_5 : f32 to vector<8x64xf32>
    %8 = arith.maximumf %6, %7 : vector<8x64xf32>
    %9 = arith.truncf %8 : vector<8x64xf32> to vector<8x64xbf16>
    %c32 = arith.constant 32 : index
    %c0_6 = arith.constant 0 : index
    %10 = vector.load %arg2[%c32, %c0_6] : memref<288x128xbf16, #tpu.memory_space<vmem>>, vector<64x128xbf16>
    %cst_7 = arith.constant dense<0.000000e+00> : vector<8x128xf32>
    %11 = tpu.matmul %9, %10, %cst_7 {dimension_numbers = #tpu.dot_dimension_numbers<[1], [0], [0], [1], [0, 0, 1, 1], [], []>} : vector<8x64xbf16>, vector<64x128xbf16>, vector<8x128xf32> -> vector<8x128xf32>
    %c1 = arith.constant 1 : index
    %c0_8 = arith.constant 0 : index
    %12 = vector.load %arg3[%c1, %c0_8] : memref<8x128xf32, #tpu.memory_space<vmem>>, vector<1x128xf32>
    %13 = vector.broadcast %12 : vector<1x128xf32> to vector<8x128xf32>
    %14 = arith.addf %11, %13 : vector<8x128xf32>
    %15 = vector.extract_strided_slice %14 {offsets = [0, 0], sizes = [8, 32], strides = [1, 1]} : vector<8x128xf32> to vector<8x32xf32>
    %16 = vector.extract_strided_slice %14 {offsets = [0, 32], sizes = [8, 32], strides = [1, 1]} : vector<8x128xf32> to vector<8x32xf32>
    %17 = vector.extract_strided_slice %14 {offsets = [0, 64], sizes = [8, 32], strides = [1, 1]} : vector<8x128xf32> to vector<8x32xf32>
    %18 = vector.extract_strided_slice %14 {offsets = [0, 96], sizes = [8, 32], strides = [1, 1]} : vector<8x128xf32> to vector<8x32xf32>
    %19 = tpu.concatenate %15, %16, %17, %18 in 0 : vector<8x32xf32>, vector<8x32xf32>, vector<8x32xf32>, vector<8x32xf32> -> vector<32x32xf32>
    %20 = arith.truncf %19 : vector<32x32xf32> to vector<32x32xbf16>
    %c96 = arith.constant 96 : index
    %c0_9 = arith.constant 0 : index
    %21 = vector.load %arg2[%c96, %c0_9] : memref<288x128xbf16, #tpu.memory_space<vmem>>, vector<32x96xbf16>
    %cst_10 = arith.constant dense<0.000000e+00> : vector<32x96xf32>
    %22 = tpu.matmul %20, %21, %cst_10 {dimension_numbers = #tpu.dot_dimension_numbers<[1], [0], [0], [1], [0, 0, 1, 1], [], []>} : vector<32x32xbf16>, vector<32x96xbf16>, vector<32x96xf32> -> vector<32x96xf32>
    %23 = tpu.iota {dimensions = array<i32: 0>} : vector<32x32xi32>
    %c8_i32 = arith.constant 8 : i32
    %c0_i32 = arith.constant 0 : i32
    %24 = arith.cmpi eq, %c8_i32, %c0_i32 : i32
    %c1_i32 = arith.constant 1 : i32
    %25 = arith.select %24, %c1_i32, %c8_i32 : i32
    %26 = vector.broadcast %25 : i32 to vector<32x32xi32>
    %27 = arith.remsi %23, %26 : vector<32x32xi32>
    %c0_i32_11 = arith.constant 0 : i32
    %28 = vector.broadcast %c0_i32_11 : i32 to vector<32x32xi32>
    %29 = arith.cmpi ne, %27, %28 : vector<32x32xi32>
    %c0_i32_12 = arith.constant 0 : i32
    %30 = vector.broadcast %c0_i32_12 : i32 to vector<32x32xi32>
    %31 = arith.cmpi slt, %27, %30 : vector<32x32xi32>
    %c0_i32_13 = arith.constant 0 : i32
    %32 = arith.cmpi slt, %25, %c0_i32_13 : i32
    %33 = vector.broadcast %32 : i1 to vector<32x32xi1>
    %34 = vector.broadcast %33 : vector<32x32xi1> to vector<32x32xi1>
    %35 = arith.xori %31, %34 : vector<32x32xi1>
    %36 = arith.andi %35, %29 : vector<32x32xi1>
    %37 = vector.broadcast %25 : i32 to vector<32x32xi32>
    %38 = arith.addi %27, %37 : vector<32x32xi32>
    %39 = arith.select %36, %38, %27 : vector<32x32xi1>, vector<32x32xi32>
    %40 = tpu.iota {dimensions = array<i32: 1>} : vector<32x32xi32>
    %c8_i32_14 = arith.constant 8 : i32
    %c0_i32_15 = arith.constant 0 : i32
    %41 = arith.cmpi eq, %c8_i32_14, %c0_i32_15 : i32
    %c1_i32_16 = arith.constant 1 : i32
    %42 = arith.select %41, %c1_i32_16, %c8_i32_14 : i32
    %43 = vector.broadcast %42 : i32 to vector<32x32xi32>
    %44 = arith.remsi %40, %43 : vector<32x32xi32>
    %c0_i32_17 = arith.constant 0 : i32
    %45 = vector.broadcast %c0_i32_17 : i32 to vector<32x32xi32>
    %46 = arith.cmpi ne, %44, %45 : vector<32x32xi32>
    %c0_i32_18 = arith.constant 0 : i32
    %47 = vector.broadcast %c0_i32_18 : i32 to vector<32x32xi32>
    %48 = arith.cmpi slt, %44, %47 : vector<32x32xi32>
    %c0_i32_19 = arith.constant 0 : i32
    %49 = arith.cmpi slt, %42, %c0_i32_19 : i32
    %50 = vector.broadcast %49 : i1 to vector<32x32xi1>
    %51 = vector.broadcast %50 : vector<32x32xi1> to vector<32x32xi1>
    %52 = arith.xori %48, %51 : vector<32x32xi1>
    %53 = arith.andi %52, %46 : vector<32x32xi1>
    %54 = vector.broadcast %42 : i32 to vector<32x32xi32>
    %55 = arith.addi %44, %54 : vector<32x32xi32>
    %56 = arith.select %53, %55, %44 : vector<32x32xi1>, vector<32x32xi32>
    %57 = arith.cmpi eq, %39, %56 : vector<32x32xi32>
    %58 = vector.extract_strided_slice %22 {offsets = [0, 0], sizes = [32, 16], strides = [1, 1]} : vector<32x96xf32> to vector<32x16xf32>
    %59 = arith.truncf %58 : vector<32x16xf32> to vector<32x16xbf16>
    %60 = vector.extract_strided_slice %22 {offsets = [0, 32], sizes = [32, 16], strides = [1, 1]} : vector<32x96xf32> to vector<32x16xf32>
    %61 = arith.truncf %60 : vector<32x16xf32> to vector<32x16xbf16>
    %62 = vector.extract_strided_slice %22 {offsets = [0, 64], sizes = [32, 16], strides = [1, 1]} : vector<32x96xf32> to vector<32x16xf32>
    %63 = arith.truncf %62 : vector<32x16xf32> to vector<32x16xbf16>
    %cst_20 = arith.constant dense<0.000000e+00> : vector<32x32xf32>
    %64 = tpu.matmul %59, %61, %cst_20 {dimension_numbers = #tpu.dot_dimension_numbers<[1], [1], [0], [0], [0, 0, 1, 0], [], []>} : vector<32x16xbf16>, vector<32x16xbf16>, vector<32x32xf32> -> vector<32x32xf32>
    %cst_21 = arith.constant 2.500000e-01 : f32
    %65 = vector.broadcast %cst_21 : f32 to vector<32x32xf32>
    %66 = arith.mulf %64, %65 : vector<32x32xf32>
    %cst_22 = arith.constant -1.000000e+30 : f32
    %67 = vector.broadcast %cst_22 : f32 to vector<32x32xf32>
    %68 = arith.select %57, %66, %67 : vector<32x32xi1>, vector<32x32xf32>
    %cst_23 = arith.constant dense<0xFF800000> : vector<32xf32>
    %69 = vector.multi_reduction <maximumf>, %68, %cst_23 [1] : vector<32x32xf32> to vector<32xf32>
    %70 = vector.shape_cast %69 : vector<32xf32> to vector<32x1xf32>
    %71 = vector.broadcast %70 : vector<32x1xf32> to vector<32x32xf32>
    %72 = arith.subf %68, %71 : vector<32x32xf32>
    %73 = math.exp %72 : vector<32x32xf32>
    %cst_24 = arith.constant dense<0.000000e+00> : vector<32xf32>
    %74 = vector.multi_reduction <add>, %73, %cst_24 [1] : vector<32x32xf32> to vector<32xf32>
    %75 = vector.shape_cast %74 : vector<32xf32> to vector<32x1xf32>
    %76 = tpu.reciprocal %75 {approx = true} : vector<32x1xf32> -> vector<32x1xf32>
    %77 = vector.broadcast %76 : vector<32x1xf32> to vector<32x32xf32>
    %78 = arith.mulf %73, %77 : vector<32x32xf32>
    %79 = arith.truncf %78 : vector<32x32xf32> to vector<32x32xbf16>
    %cst_25 = arith.constant dense<0.000000e+00> : vector<32x16xf32>
    %80 = tpu.matmul %79, %63, %cst_25 {dimension_numbers = #tpu.dot_dimension_numbers<[1], [0], [0], [1], [0, 0, 1, 1], [], []>} : vector<32x32xbf16>, vector<32x16xbf16>, vector<32x16xf32> -> vector<32x16xf32>
    %81 = vector.extract_strided_slice %22 {offsets = [0, 16], sizes = [32, 16], strides = [1, 1]} : vector<32x96xf32> to vector<32x16xf32>
    %82 = arith.truncf %81 : vector<32x16xf32> to vector<32x16xbf16>
    %83 = vector.extract_strided_slice %22 {offsets = [0, 48], sizes = [32, 16], strides = [1, 1]} : vector<32x96xf32> to vector<32x16xf32>
    %84 = arith.truncf %83 : vector<32x16xf32> to vector<32x16xbf16>
    %85 = vector.extract_strided_slice %22 {offsets = [0, 80], sizes = [32, 16], strides = [1, 1]} : vector<32x96xf32> to vector<32x16xf32>
    %86 = arith.truncf %85 : vector<32x16xf32> to vector<32x16xbf16>
    %cst_26 = arith.constant dense<0.000000e+00> : vector<32x32xf32>
    %87 = tpu.matmul %82, %84, %cst_26 {dimension_numbers = #tpu.dot_dimension_numbers<[1], [1], [0], [0], [0, 0, 1, 0], [], []>} : vector<32x16xbf16>, vector<32x16xbf16>, vector<32x32xf32> -> vector<32x32xf32>
    %cst_27 = arith.constant 2.500000e-01 : f32
    %88 = vector.broadcast %cst_27 : f32 to vector<32x32xf32>
    %89 = arith.mulf %87, %88 : vector<32x32xf32>
    %cst_28 = arith.constant -1.000000e+30 : f32
    %90 = vector.broadcast %cst_28 : f32 to vector<32x32xf32>
    %91 = arith.select %57, %89, %90 : vector<32x32xi1>, vector<32x32xf32>
    %cst_29 = arith.constant dense<0xFF800000> : vector<32xf32>
    %92 = vector.multi_reduction <maximumf>, %91, %cst_29 [1] : vector<32x32xf32> to vector<32xf32>
    %93 = vector.shape_cast %92 : vector<32xf32> to vector<32x1xf32>
    %94 = vector.broadcast %93 : vector<32x1xf32> to vector<32x32xf32>
    %95 = arith.subf %91, %94 : vector<32x32xf32>
    %96 = math.exp %95 : vector<32x32xf32>
    %cst_30 = arith.constant dense<0.000000e+00> : vector<32xf32>
    %97 = vector.multi_reduction <add>, %96, %cst_30 [1] : vector<32x32xf32> to vector<32xf32>
    %98 = vector.shape_cast %97 : vector<32xf32> to vector<32x1xf32>
    %99 = tpu.reciprocal %98 {approx = true} : vector<32x1xf32> -> vector<32x1xf32>
    %100 = vector.broadcast %99 : vector<32x1xf32> to vector<32x32xf32>
    %101 = arith.mulf %96, %100 : vector<32x32xf32>
    %102 = arith.truncf %101 : vector<32x32xf32> to vector<32x32xbf16>
    %cst_31 = arith.constant dense<0.000000e+00> : vector<32x16xf32>
    %103 = tpu.matmul %102, %86, %cst_31 {dimension_numbers = #tpu.dot_dimension_numbers<[1], [0], [0], [1], [0, 0, 1, 1], [], []>} : vector<32x32xbf16>, vector<32x16xbf16>, vector<32x16xf32> -> vector<32x16xf32>
    %104 = tpu.concatenate %80, %103 in 1 : vector<32x16xf32>, vector<32x16xf32> -> vector<32x32xf32>
    %105 = arith.truncf %104 : vector<32x32xf32> to vector<32x32xbf16>
    %c128 = arith.constant 128 : index
    %c0_32 = arith.constant 0 : index
    %106 = vector.load %arg2[%c128, %c0_32] : memref<288x128xbf16, #tpu.memory_space<vmem>>, vector<32x32xbf16>
    %cst_33 = arith.constant dense<0.000000e+00> : vector<32x32xf32>
    %107 = tpu.matmul %105, %106, %cst_33 {dimension_numbers = #tpu.dot_dimension_numbers<[1], [0], [0], [1], [0, 0, 1, 1], [], []>} : vector<32x32xbf16>, vector<32x32xbf16>, vector<32x32xf32> -> vector<32x32xf32>
    %c2 = arith.constant 2 : index
    %c0_34 = arith.constant 0 : index
    %108 = vector.load %arg3[%c2, %c0_34] : memref<8x128xf32, #tpu.memory_space<vmem>>, vector<1x32xf32>
    %109 = vector.broadcast %108 : vector<1x32xf32> to vector<32x32xf32>
    %110 = arith.addf %107, %109 : vector<32x32xf32>
    %cst_35 = arith.constant 0.000000e+00 : f32
    %111 = vector.broadcast %cst_35 : f32 to vector<32x32xf32>
    %112 = arith.maximumf %110, %111 : vector<32x32xf32>
    %113 = arith.truncf %112 : vector<32x32xf32> to vector<32x32xbf16>
    %c160 = arith.constant 160 : index
    %c0_36 = arith.constant 0 : index
    %114 = vector.load %arg2[%c160, %c0_36] : memref<288x128xbf16, #tpu.memory_space<vmem>>, vector<32x32xbf16>
    %cst_37 = arith.constant dense<0.000000e+00> : vector<32x32xf32>
    %115 = tpu.matmul %113, %114, %cst_37 {dimension_numbers = #tpu.dot_dimension_numbers<[1], [0], [0], [1], [0, 0, 1, 1], [], []>} : vector<32x32xbf16>, vector<32x32xbf16>, vector<32x32xf32> -> vector<32x32xf32>
    %c3 = arith.constant 3 : index
    %c0_38 = arith.constant 0 : index
    %116 = vector.load %arg3[%c3, %c0_38] : memref<8x128xf32, #tpu.memory_space<vmem>>, vector<1x32xf32>
    %117 = vector.broadcast %116 : vector<1x32xf32> to vector<32x32xf32>
    %118 = arith.addf %115, %117 : vector<32x32xf32>
    %119 = arith.truncf %118 : vector<32x32xf32> to vector<32x32xbf16>
    %c192 = arith.constant 192 : index
    %c0_39 = arith.constant 0 : index
    %120 = vector.load %arg2[%c192, %c0_39] : memref<288x128xbf16, #tpu.memory_space<vmem>>, vector<32x96xbf16>
    %cst_40 = arith.constant dense<0.000000e+00> : vector<32x96xf32>
    %121 = tpu.matmul %119, %120, %cst_40 {dimension_numbers = #tpu.dot_dimension_numbers<[1], [0], [0], [1], [0, 0, 1, 1], [], []>} : vector<32x32xbf16>, vector<32x96xbf16>, vector<32x96xf32> -> vector<32x96xf32>
    %c4 = arith.constant 4 : index
    %c0_41 = arith.constant 0 : index
    %122 = vector.load %arg3[%c4, %c0_41] : memref<8x128xf32, #tpu.memory_space<vmem>>, vector<1x96xf32>
    %123 = vector.broadcast %122 : vector<1x96xf32> to vector<32x96xf32>
    %124 = arith.addf %121, %123 : vector<32x96xf32>
    %c224 = arith.constant 224 : index
    %c0_42 = arith.constant 0 : index
    %125 = vector.load %arg2[%c224, %c0_42] : memref<288x128xbf16, #tpu.memory_space<vmem>>, vector<32x96xbf16>
    %cst_43 = arith.constant dense<0.000000e+00> : vector<32x96xf32>
    %126 = tpu.matmul %119, %125, %cst_43 {dimension_numbers = #tpu.dot_dimension_numbers<[1], [0], [0], [1], [0, 0, 1, 1], [], []>} : vector<32x32xbf16>, vector<32x96xbf16>, vector<32x96xf32> -> vector<32x96xf32>
    %c5 = arith.constant 5 : index
    %c0_44 = arith.constant 0 : index
    %127 = vector.load %arg3[%c5, %c0_44] : memref<8x128xf32, #tpu.memory_space<vmem>>, vector<1x96xf32>
    %128 = vector.broadcast %127 : vector<1x96xf32> to vector<32x96xf32>
    %129 = arith.addf %126, %128 : vector<32x96xf32>
    %cst_45 = arith.constant -1.000000e+01 : f32
    %cst_46 = arith.constant 0.000000e+00 : f32
    %130 = vector.broadcast %cst_45 : f32 to vector<32x96xf32>
    %131 = arith.maximumf %130, %129 : vector<32x96xf32>
    %132 = vector.broadcast %cst_46 : f32 to vector<32x96xf32>
    %133 = arith.minimumf %132, %131 : vector<32x96xf32>
    %c256 = arith.constant 256 : index
    %c0_47 = arith.constant 0 : index
    %134 = vector.load %arg2[%c256, %c0_47] : memref<288x128xbf16, #tpu.memory_space<vmem>>, vector<32x96xbf16>
    %cst_48 = arith.constant dense<0.000000e+00> : vector<32x96xf32>
    %135 = tpu.matmul %119, %134, %cst_48 {dimension_numbers = #tpu.dot_dimension_numbers<[1], [0], [0], [1], [0, 0, 1, 1], [], []>} : vector<32x32xbf16>, vector<32x96xbf16>, vector<32x96xf32> -> vector<32x96xf32>
    %c6 = arith.constant 6 : index
    %c0_49 = arith.constant 0 : index
    %136 = vector.load %arg3[%c6, %c0_49] : memref<8x128xf32, #tpu.memory_space<vmem>>, vector<1x96xf32>
    %137 = vector.broadcast %136 : vector<1x96xf32> to vector<32x96xf32>
    %138 = arith.addf %135, %137 : vector<32x96xf32>
    %139 = vector.extract_strided_slice %138 {offsets = [0, 0], sizes = [32, 32], strides = [1, 1]} : vector<32x96xf32> to vector<32x32xf32>
    %140 = vector.extract_strided_slice %138 {offsets = [0, 32], sizes = [32, 32], strides = [1, 1]} : vector<32x96xf32> to vector<32x32xf32>
    %141 = vector.extract_strided_slice %138 {offsets = [0, 64], sizes = [32, 32], strides = [1, 1]} : vector<32x96xf32> to vector<32x32xf32>
    %142 = arith.maximumf %139, %140 : vector<32x32xf32>
    %143 = arith.maximumf %142, %141 : vector<32x32xf32>
    %144 = arith.subf %139, %143 : vector<32x32xf32>
    %145 = math.exp %144 : vector<32x32xf32>
    %146 = arith.subf %140, %143 : vector<32x32xf32>
    %147 = math.exp %146 : vector<32x32xf32>
    %148 = arith.subf %141, %143 : vector<32x32xf32>
    %149 = math.exp %148 : vector<32x32xf32>
    %150 = arith.addf %145, %147 : vector<32x32xf32>
    %151 = arith.addf %150, %149 : vector<32x32xf32>
    %cst_50 = arith.constant 1.000000e+00 : f32
    %152 = vector.broadcast %cst_50 : f32 to vector<32x32xf32>
    %153 = arith.divf %152, %151 : vector<32x32xf32>
    %cst_51 = arith.constant 0.000000e+00 : f32
    %154 = vector.broadcast %cst_51 : f32 to vector<32x32xf32>
    %cst_52 = arith.constant 0.000000e+00 : f32
    %155 = vector.broadcast %cst_52 : f32 to vector<32x32xf32>
    %156 = arith.mulf %145, %153 : vector<32x32xf32>
    %157 = vector.extract_strided_slice %124 {offsets = [0, 0], sizes = [32, 32], strides = [1, 1]} : vector<32x96xf32> to vector<32x32xf32>
    %158 = arith.mulf %156, %157 : vector<32x32xf32>
    %159 = arith.addf %154, %158 : vector<32x32xf32>
    %160 = vector.extract_strided_slice %133 {offsets = [0, 0], sizes = [32, 32], strides = [1, 1]} : vector<32x96xf32> to vector<32x32xf32>
    %161 = arith.mulf %156, %160 : vector<32x32xf32>
    %162 = arith.addf %155, %161 : vector<32x32xf32>
    %163 = arith.mulf %147, %153 : vector<32x32xf32>
    %164 = vector.extract_strided_slice %124 {offsets = [0, 32], sizes = [32, 32], strides = [1, 1]} : vector<32x96xf32> to vector<32x32xf32>
    %165 = arith.mulf %163, %164 : vector<32x32xf32>
    %166 = arith.addf %159, %165 : vector<32x32xf32>
    %167 = vector.extract_strided_slice %133 {offsets = [0, 32], sizes = [32, 32], strides = [1, 1]} : vector<32x96xf32> to vector<32x32xf32>
    %168 = arith.mulf %163, %167 : vector<32x32xf32>
    %169 = arith.addf %162, %168 : vector<32x32xf32>
    %170 = arith.mulf %149, %153 : vector<32x32xf32>
    %171 = vector.extract_strided_slice %124 {offsets = [0, 64], sizes = [32, 32], strides = [1, 1]} : vector<32x96xf32> to vector<32x32xf32>
    %172 = arith.mulf %170, %171 : vector<32x32xf32>
    %173 = arith.addf %166, %172 : vector<32x32xf32>
    %174 = vector.extract_strided_slice %133 {offsets = [0, 64], sizes = [32, 32], strides = [1, 1]} : vector<32x96xf32> to vector<32x32xf32>
    %175 = arith.mulf %170, %174 : vector<32x32xf32>
    %176 = arith.addf %169, %175 : vector<32x32xf32>
    %cst_53 = arith.constant 5.000000e-01 : f32
    %177 = vector.broadcast %cst_53 : f32 to vector<32x32xf32>
    %178 = arith.mulf %177, %176 : vector<32x32xf32>
    %179 = math.exp %178 : vector<32x32xf32>
    %c0_54 = arith.constant 0 : index
    %c0_55 = arith.constant 0 : index
    %180 = vector.load %arg4[%c0_54, %c0_55] : memref<32x32xf32, #tpu.memory_space<vmem>>, vector<32x32xf32>
    %181 = arith.mulf %180, %179 : vector<32x32xf32>
    %182 = arith.addf %173, %181 : vector<32x32xf32>
    %cst_56 = arith.constant 0.000000e+00 : f32
    %183 = vector.broadcast %cst_56 : f32 to vector<32x32xf32>
    %cst_57 = arith.constant 0.000000e+00 : f32
    %184 = vector.broadcast %cst_57 : f32 to vector<32x32xf32>
    %cst_58 = arith.constant 0.000000e+00 : f32
    %185 = vector.broadcast %cst_58 : f32 to vector<32x32xf32>
    %186 = tpu.concatenate %182, %173, %176, %183, %124, %184, %133, %185 in 1 : vector<32x32xf32>, vector<32x32xf32>, vector<32x32xf32>, vector<32x32xf32>, vector<32x96xf32>, vector<32x32xf32>, vector<32x96xf32>, vector<32x32xf32> -> vector<32x384xf32>
    %c0_59 = arith.constant 0 : index
    %c0_60 = arith.constant 0 : index
    %187 = vector.load %arg5[%c0_59, %c0_60] : memref<32x384xf32, #tpu.memory_space<vmem>>, vector<32x384xf32>
    tpu.vector_store %arg5[%c0_59, %c0_60], %186 {strides = array<i32>} : memref<32x384xf32, #tpu.memory_space<vmem>>, vector<32x384xf32>,
    return
  }
  func.func @transform_0(%arg0: i32) -> (i32, i32) {
    %c0_i32 = arith.constant 0 : i32
    %c0_i32_0 = arith.constant 0 : i32
    return %arg0, %c0_i32 : i32, i32
  }
  func.func @transform_1(%arg0: i32) -> (i32, i32) {
    %c0_i32 = arith.constant 0 : i32
    %c0_i32_0 = arith.constant 0 : i32
    %c0_i32_1 = arith.constant 0 : i32
    return %c0_i32, %c0_i32_0 : i32, i32
  }
  func.func @transform_2(%arg0: i32) -> (i32, i32) {
    %c0_i32 = arith.constant 0 : i32
    %c0_i32_0 = arith.constant 0 : i32
    %c0_i32_1 = arith.constant 0 : i32
    return %c0_i32, %c0_i32_0 : i32, i32
  }
  func.func @transform_3(%arg0: i32) -> (i32, i32) {
    %c0_i32 = arith.constant 0 : i32
    %c0_i32_0 = arith.constant 0 : i32
    return %arg0, %c0_i32 : i32, i32
  }
  func.func @transform_4(%arg0: i32) -> (i32, i32) {
    %c0_i32 = arith.constant 0 : i32
    %c0_i32_0 = arith.constant 0 : i32
    return %arg0, %c0_i32 : i32, i32
  }
}

</mosaic_0001>

<bundles_post_ra>
// kernel: multi_strategy_coach_forward.1
= control target key start
LH: loop header
LB: loop body
LE: loop exit
PB: predicated region body
PF: predicated region fallthrough
CT: control target
= control target key end

     0   :  { %9 = vsyncpa [#allocation3], 0  ;;  %s1839_s15 = smov [#allocation2]   ;;  %s2300_s0 = inlined_call_operand.vmem [shape: f32[8,32], index: 0, kind: input, shape index: {}]   ;;  %s2301_s1 = inlined_call_operand.hbm [shape: bf16[288,128], index: 1, kind: input, shape index: {}]   ;;  %s2302_s2 = inlined_call_operand.vmem [shape: f32[8,128], index: 2, kind: input, shape index: {}]   ;;  %s2303_s3 = inlined_call_operand.vmem [shape: f32[32,32], index: 3, kind: input, shape index: {}]   ;;  %s2304_s4 = inlined_call_operand.vmem [shape: f32[32,384], index: 4, kind: output, shape index: {}]  }
   0x1   :  { %s17_s16 = sshll.u32 %s1839_s15, 4  ;;  %s1815_s19 = scalar_lea.hbm %s2301_s1, 2304  ;;  %s18_s16 = int_to_ptr.vmem [resolvable:$true] %s17_s16 }
   0x2   :  { %p1816_p0 = scmp.ne.s32.totalorder %s2301_s1, %s1815_s19  ;;  %p1819_p1 = scmp.lt.u32.totalorder %s1815_s19, %s2301_s1 }
   0x4   :  { %p1821_p2 = pnand %p1819_p1, %p1816_p0 }
   0x6   :  { %1824 = shalt.err (!%p1821_p2)
}
   0x7   :  { %s1825_s24 = scalar_lea.vmem %s18_s16, 2304  ;;  %p1830_p4 = scmp.lt.s32.totalorder %s18_s16, %s18_s16 }
   0x8   :  { %p1826_p3 = scmp.ne.s32.totalorder %s18_s16, %s1825_s24  ;;  %p1831_p5 = scmp.lt.s32.totalorder %s1825_s24, %s1825_s24 }
   0xa   :  { %p1832_p6 = por %p1831_p5, %p1830_p4 }
   0xc   :  { %p1833_p7 = pnand %p1832_p6, %p1826_p3 }
   0xe   :  { %1836 = shalt.err (!%p1833_p7)
}
   0xf   :  { %s1840_s25 = smov 64   ;;  %s1841_s26 = smov 4  }
  0x10   :  { %23 = dma.hbm_to_vmem [thread:$0]  %s2301_s1, 2304, %s18_s16, [#allocation3], %s1840_s25, %s1840_s25, %s1841_s26  }
  0x11   :  { %1837 = dma.done.wait [#allocation3], 2304  }
  0x12   :  { %1838 = vsyncadd [#allocation3], 4294964992  ;;  %v1842_v0 = vmov 0.0   ;;  %vm1843_vm0 = vmmov 0   ;;  %v1725_v1 = vld [vmem:[#allocation2] sm:$0xff]   ;;  %v1726_v2 = vld [vmem:[#allocation2 + $0x8] sm:$0xff]   ;;  %v265_v40 = vlaneseq }
  0x13   :  { %1600 = vmatprep.subr.bf16.mxu0 %v1842_v0  ;;  %1604 = vmatprep.mubr.msk.bf16.mxu0 %vm1843_vm0, %v1842_v0  ;;  %v32_v3 = vld [vmem:[%s2300_s0] sm:$0xff]  ;;  %v1727_v4 = vld [vmem:[#allocation2 + $0x10] sm:$0xff]   ;;  %vm55_vm1 = vcmask 261120   ;;  %v1728_v5 = vld [vmem:[#allocation2 + $0x18] sm:$0xff]   ;;  %vm138_vm2 = vcmask 523264   ;;  %s1844_s7 = smov 32  }
  0x14   :  { %1608 = vmatprep.subr.bf16.mxu1 %v1842_v0  ;;  %1616 = vmatprep.mubr.msk.bf16.mxu1 %vm1843_vm0, %v1842_v0  ;;  %v33_v6 = vpack.c.bf16 %v32_v3, %v32_v3  ;;  %v1729_v7 = vld [vmem:[#allocation2 + $0x20] sm:$0xff]   ;;  %v1730_v8 = vld [vmem:[#allocation2 + $0x28] sm:$0xff]   ;;  %v1731_v17 = vld [vmem:[#allocation2 + $0x30] sm:$0xff]   ;;  %s1845_s8 = smov 96   ;;  %vm344_vm3 = vcmask 130048   ;;  %v266_v41 = vshrl.u32 %v265_v40, 7 }
  0x15   :  { %1601 = vmatpush3.bf16.msra.mxu0 %v1725_v1  ;;  %1609 = vmatpush3.bf16.msra.mxu1 %v1727_v4  ;;  %v1505_v9 = vld [vmem:[%s2302_s2] ss:$0 sm:$0xff]  ;;  %v1732_v18 = vld [vmem:[#allocation2 + $0x38] sm:$0xff]   ;;  %v1509_v19 = vld [vmem:[%s2302_s2 + $0x1] ss:$0 sm:$0xff]  ;;  %v319_v42 = vand.u32 127, %v265_v40 }
  0x16   :  { %1602 = vmatprep.subr.bf16.mxu0 %v1842_v0  ;;  %1610 = vmatprep.subr.bf16.mxu1 %v1842_v0  ;;  %v267_v43 = vadd.s32 8, %v266_v41  ;;  %v269_v44 = vadd.s32 24, %v266_v41  ;;  %v274_v45 = vand.u32 7, %v266_v41  ;;  %v268_v47 = vadd.s32 16, %v266_v41  ;;  %s1846_s9 = smov 80   ;;  %s1847_s10 = smov 112  }
  0x17   :  { %v324_v46 = vand.u32 7, %v319_v42  ;;  %s1848_s11 = smov 48   ;;  %s1849_s12 = smov 16   ;;  %vm1475_vm8 = vcmask 785408  }
  0x18   :  { %v281_v48 = vand.u32 7, %v267_v43  ;;  %v295_v49 = vand.u32 7, %v269_v44  ;;  %v288_v53 = vand.u32 7, %v268_v47 }
  0x19   :  { %1603 = vmatpush3.bf16.msra.mxu0 %v1726_v2  ;;  %1611 = vmatpush3.bf16.msra.mxu1 %v1728_v5  ;;  %vm1921_vm4 = vcmp.eq.s32.totalorder %v274_v45, %v324_v46 }
  0x1a   :  { %1612 = vmatprep.subr.bf16.mxu1 %v1842_v0  ;;  %1620 = vmatprep.subr.bf16.mxu0 %v1731_v17  ;;  %vm1925_vm5 = vcmp.eq.s32.totalorder %v281_v48, %v324_v46  ;;  %vm1929_vm6 = vcmp.eq.s32.totalorder %v295_v49, %v324_v46  ;;  %vm1936_vm7 = vcmp.eq.s32.totalorder %v288_v53, %v324_v46 }
  0x1c   :  { %1605 = vmatmul.mubr.msk.bf16.vlgmr.msra.gmra.mrb[0].mxu0 %vm55_vm1, %v33_v6 }
  0x1d   :  { %1613 = vmatpush3.bf16.msra.mxu1 %v1729_v7  ;;  %1621 = vmatpush3.bf16.msra.mxu0 %v1731_v17 }
  0x1e   :  { %1614 = vmatprep.subr.bf16.mxu1 %v1842_v0  ;;  %1622 = vmatprep.subr.bf16.mxu0 %v1732_v18 }
  0x21   :  { %1615 = vmatpush3.bf16.msra.mxu1 %v1730_v8  ;;  %1623 = vmatpush3.bf16.msra.mxu0 %v1732_v18 }
  0xef   :  { %v93_v10 = vpop.f32.mrb[0].mxu0 }
  0xf0   :  { %v94_v11 = vadd.f32 %v1505_v9, %v93_v10  ;;  %v1606_v12 = vpop.f32.mrb[1].mxu0 }
  0xf1   :  { %v96_v13 = vpop.f32.mrb[2].mxu0 }
  0xf2   :  { %v99_v14 = vmax.f32 %v94_v11, 0.0  ;;  %v1607_v15 = vpop.f32.mrb[3].mxu0 }
  0xf4   :  { %v100_v16 = vpack.c.bf16 %v99_v14, %v99_v14 }
  0xf6   :  { %1617 = vmatmul.mubr.msk.bf16.vlgmr.msra.gmra.mrb[0].mxu1 %vm138_vm2, %v100_v16 }
 0x1c9   :  { %v176_v20 = vpop.f32.mrb[0].mxu1 }
 0x1ca   :  { %v177_v21 = vadd.f32 %v1509_v19, %v176_v20  ;;  %v1618_v22 = vpop.f32.mrb[1].mxu1 }
 0x1cb   :  { %v179_v23 = vpop.f32.mrb[2].mxu1 }
 0x1cc   :  { %189 = vrot.lane.b32.xlu1 %v177_v21, %s1844_s7  ;;  %183 = vrot.lane.b32.xlu0 %v177_v21, %s1845_s8  ;;  %v1619_v24 = vpop.f32.mrb[3].mxu1 }
 0x1d0   :  { %186 = vrot.lane.b32.xlu0 %v177_v21, %s1840_s25 }
 0x23e   :  { %v184_v25 = vpop.permute.xlu0 %183  ;;  %v190_v27 = vpop.permute.xlu1 %189 }
 0x23f   :  { %v192_v26 = vpack.c.bf16 %v184_v25, %v177_v21 }
 0x241   :  { %1624 = vmatprep.mubr.msk.bf16.mxu0 %vm55_vm1, %v192_v26 }
 0x242   :  { %v187_v28 = vpop.permute.xlu0 %186 }
 0x243   :  { %v193_v29 = vpack.c.bf16 %v190_v27, %v187_v28 }
 0x245   :  { %1625 = vmatmul.mubr.msk.bf16.vlgmr.msra.gmra.mrb[4].mxu0 %vm55_vm1, %v193_v29 }
 0x318   :  { %v1626_v30 = vpop.f32.mrb[4].mxu0 }
 0x319   :  { %v250_v31 = vpop.f32.mrb[5].mxu0 }
 0x31a   :  { %v1627_v32 = vpop.f32.mrb[6].mxu0 }
 0x31b   :  { %v1905_v33 = vpack.c.bf16 %v1627_v32, %v1626_v30  ;;  %v253_v34 = vpop.f32.mrb[7].mxu0 }
 0x31c   :  { %v1907_v35 = vpack.c.bf16 %v253_v34, %v250_v31 }
 0x31d   :  { %342 = vrot.lane.b32.xlu0 %v1905_v33, %s1845_s8 }
 0x31e   :  { %340 = vrot.lane.b32.xlu1 %v1907_v35, %s1845_s8  ;;  %1632 = vmatprep.mubr.msk.bf16.mxu0 %vm344_vm3, %v1907_v35 }
 0x38f   :  { %v343_v38 = vpop.permute.xlu0 %342 }
 0x390   :  { %v341_v36 = vpop.permute.xlu1 %340  ;;  %v355_v39 = vsel %vm344_vm3, %v343_v38, 0 }
 0x391   :  { %v352_v37 = vsel %vm344_vm3, %v341_v36, 0  ;;  %1700 = vmatprep.subr.msk.bf16.mxu0 %vm344_vm3, %v341_v36 }
 0x392   :  { %1629 = vmatpush3.bf16.xpose.msra.mxu0 %v352_v37 }
 0x393   :  { %1701 = vmatprep.subr.msk.bf16.mxu0 %vm344_vm3, %v343_v38 }
 0x39a   :  { %1631 = vmatpush3.bf16.xpose.msra.mxu0 %v355_v39 }
 0x3a1   :  { %1633 = vmatmul.mubr.msk.bf16.vlgmr.msra.gmra.mrb[8].mxu0 %vm344_vm3, %v1905_v33 }
 0x474   :  { %v1634_v50 = vpop.f32.mrb[8].mxu0 }
 0x475   :  { %v391_v51 = vpop.f32.mrb[9].mxu0  ;;  %v408_v60 = vmul.f32 0.25, %v1634_v50 }
 0x476   :  { %v406_v54 = vmul.f32 0.25, %v391_v51  ;;  %v1635_v55 = vpop.f32.mrb[10].mxu0 }
 0x477   :  { %v409_v56 = vmul.f32 0.25, %v1635_v55  ;;  %v394_v57 = vpop.f32.mrb[11].mxu0  ;;  %v412_v4 = vsel %vm1936_vm7, %v408_v60, -1e+30 }
 0x478   :  { %v407_v61 = vmul.f32 0.25, %v394_v57  ;;  %v410_v62 = vsel %vm1921_vm4, %v406_v54, -1e+30  ;;  %v420_v6 = vsel %vm55_vm1, %v412_v4, -inf }
 0x479   :  { %v414_v63 = vsel %vm55_vm1, %v410_v62, -inf  ;;  %v413_v2 = vsel %vm1929_vm6, %v409_v56, -1e+30 }
 0x47a   :  { %415 = vmax.xlane.f32.xlu1 %v414_v63  ;;  %v411_v1 = vsel %vm1925_vm5, %v407_v61, -1e+30  ;;  %v423_v5 = vsel %vm55_vm1, %v413_v2, -inf }
 0x47b   :  { %v417_v3 = vsel %vm55_vm1, %v411_v1, -inf }
 0x47c   :  { %418 = vmax.xlane.f32.xlu0 %v417_v3 }
 0x47e   :  { %424 = vmax.xlane.f32.xlu1 %v423_v5 }
 0x480   :  { %421 = vmax.xlane.f32.xlu0 %v420_v6 }
 0x48f   :  { %462 = vrot.lane.b32.xlu1 %v1905_v33, %s1840_s25 }
 0x507   :  { %v416_v7 = vpop.xlane.xlu1 %415 }
 0x508   :  { %v426_v11 = vsub.f32 %v410_v62, %v416_v7 }
 0x509   :  { %v419_v8 = vpop.xlane.xlu0 %418 }
 0x50a   :  { %v427_v9 = vsub.f32 %v411_v1, %v419_v8  ;;  %v430_v17 = vmul.f32 1.442695, %v426_v11 }
 0x50b   :  { %v425_v10 = vpop.xlane.xlu1 %424 }
 0x50c   :  { %v429_v12 = vsub.f32 %v413_v2, %v425_v10  ;;  %v432_v13 = vmul.f32 1.442695, %v427_v9 }
 0x50d   :  { %v422_v14 = vpop.xlane.xlu0 %421 }
 0x50e   :  { %v436_v15 = vmul.f32 1.442695, %v429_v12  ;;  %v428_v16 = vsub.f32 %v412_v4, %v422_v14 }
 0x50f   :  { %v463_v27 = vpop.permute.xlu1 %462 }
 0x510   :  { %1743 = vpow2.f32 %v436_v15  ;;  %v434_v18 = vmul.f32 1.442695, %v428_v16 }
 0x511   :  { %1745 = vpow2.f32 %v432_v13 }
 0x512   :  { %1747 = vpow2.f32 %v434_v18 }
 0x513   :  { %1749 = vpow2.f32 %v430_v17 }
 0x51a   :  { %v1744_v19 = vpop.eup %1743 }
 0x51b   :  { %v1746_v20 = vpop.eup %1745  ;;  %v447_v21 = vsel %vm55_vm1, %v1744_v19, 0.0 }
 0x51c   :  { %v1748_v22 = vpop.eup %1747  ;;  %448 = vadd.xlane.f32.xlu1 %v447_v21  ;;  %v441_v25 = vsel %vm55_vm1, %v1746_v20, 0.0 }
 0x51d   :  { %v444_v23 = vsel %vm55_vm1, %v1748_v22, 0.0  ;;  %v1750_v24 = vpop.eup %1749 }
 0x51e   :  { %445 = vadd.xlane.f32.xlu0 %v444_v23  ;;  %v438_v26 = vsel %vm55_vm1, %v1750_v24, 0.0 }
 0x520   :  { %442 = vadd.xlane.f32.xlu1 %v441_v25 }
 0x522   :  { %439 = vadd.xlane.f32.xlu0 %v438_v26 }
 0x531   :  { %525 = vrot.lane.b32.xlu1 %v1907_v35, %s1846_s9 }
 0x535   :  { %521 = vrot.lane.b32.xlu1 %v1907_v35, %s1847_s10 }
 0x538   :  { %460 = vrot.lane.b32.xlu0 %v1907_v35, %s1840_s25 }
 0x53c   :  { %527 = vrot.lane.b32.xlu0 %v1905_v33, %s1846_s9 }
 0x540   :  { %523 = vrot.lane.b32.xlu0 %v1905_v33, %s1847_s10 }
 0x5a9   :  { %v449_v28 = vpop.xlane.xlu1 %448 }
 0x5ab   :  { %v446_v29 = vpop.xlane.xlu0 %445 }
 0x5ac   :  { %1751 = vrcp.f32 %v446_v29 }
 0x5ad   :  { %v443_v30 = vpop.xlane.xlu1 %442 }
 0x5ae   :  { %1753 = vrcp.f32 %v443_v30 }
 0x5af   :  { %1755 = vrcp.f32 %v449_v28  ;;  %v440_v31 = vpop.xlane.xlu0 %439 }
 0x5b0   :  { %1757 = vrcp.f32 %v440_v31 }
 0x5b1   :  { %v526_v38 = vpop.permute.xlu1 %525 }
 0x5b2   :  { %v536_v47 = vsel %vm344_vm3, %v526_v38, 0 }
 0x5b3   :  { %v461_v32 = vpop.permute.xlu0 %460 }
 0x5b4   :  { %1636 = vmatprep.subr.bf16.mxu1 %v461_v32 }
 0x5b5   :  { %1637 = vmatpush3.bf16.msra.mxu1 %v461_v32  ;;  %v522_v46 = vpop.permute.xlu1 %521 }
 0x5b6   :  { %1638 = vmatprep.subr.bf16.mxu1 %v463_v27  ;;  %v1752_v34 = vpop.eup %1751 }
 0x5b7   :  { %v456_v40 = vmul.f32 %v1752_v34, %v1748_v22  ;;  %v528_v48 = vpop.permute.xlu0 %527 }
 0x5b8   :  { %v1754_v36 = vpop.eup %1753  ;;  %v539_v49 = vsel %vm344_vm3, %v528_v48, 0 }
 0x5b9   :  { %v1756_v37 = vpop.eup %1755  ;;  %1639 = vmatpush3.bf16.msra.mxu1 %v463_v27  ;;  %v455_v42 = vmul.f32 %v1754_v36, %v1746_v20 }
 0x5ba   :  { %v1758_v39 = vpop.eup %1757  ;;  %1702 = vmatprep.subr.msk.bf16.mxu1 %vm344_vm3, %v526_v38  ;;  %v457_v43 = vmul.f32 %v1756_v37, %v1744_v19 }
 0x5bb   :  { %v454_v41 = vmul.f32 %v1758_v39, %v1750_v24  ;;  %v524_v50 = vpop.permute.xlu0 %523 }
 0x5bc   :  { %v459_v45 = vpack.c.bf16 %v457_v43, %v456_v40  ;;  %v1733_v43 = vld [vmem:[#allocation2 + $0x40] sm:$0xff]  }
 0x5bd   :  { %v458_v44 = vpack.c.bf16 %v455_v42, %v454_v41 }
 0x5bf   :  { %1640 = vmatprep.mubr.msk.bf16.mxu1 %vm55_vm1, %v458_v44  ;;  %v1734_v44 = vld [vmem:[#allocation2 + $0x48] sm:$0xff]  }
 0x5c0   :  { %1641 = vmatmul.mubr.msk.bf16.vlgmr.msra.gmra.mrb[4].mxu1 %vm55_vm1, %v459_v45 }
 0x5c1   :  { %1648 = vmatprep.mubr.msk.bf16.mxu1 %vm344_vm3, %v522_v46 }
 0x5c2   :  { %1645 = vmatpush3.bf16.xpose.msra.mxu1 %v536_v47 }
 0x5c3   :  { %1703 = vmatprep.subr.msk.bf16.mxu1 %vm344_vm3, %v528_v48 }
 0x5ca   :  { %1647 = vmatpush3.bf16.xpose.msra.mxu1 %v539_v49 }
 0x5d1   :  { %1649 = vmatmul.mubr.msk.bf16.vlgmr.msra.gmra.mrb[8].mxu1 %vm344_vm3, %v524_v50 }
 0x693   :  { %v1969_v51 = vpop.f32.mrb[4].mxu1 }
 0x694   :  { %v1971_v53 = vpop.f32.mrb[5].mxu1 }
 0x695   :  { %v1973_v54 = vpop.f32.mrb[6].mxu1 }
 0x696   :  { %v1975_v55 = vpop.f32.mrb[7].mxu1 }
 0x6a4   :  { %v1650_v56 = vpop.f32.mrb[8].mxu1 }
 0x6a5   :  { %v575_v57 = vpop.f32.mrb[9].mxu1  ;;  %v592_v1 = vmul.f32 0.25, %v1650_v56 }
 0x6a6   :  { %v590_v60 = vmul.f32 0.25, %v575_v57  ;;  %v1651_v61 = vpop.f32.mrb[10].mxu1 }
 0x6a7   :  { %v593_v62 = vmul.f32 0.25, %v1651_v61  ;;  %v578_v63 = vpop.f32.mrb[11].mxu1  ;;  %v596_v8 = vsel %vm1936_vm7, %v592_v1, -1e+30 }
 0x6a8   :  { %v591_v2 = vmul.f32 0.25, %v578_v63  ;;  %v594_v3 = vsel %vm1921_vm4, %v590_v60, -1e+30  ;;  %v604_v52 = vsel %vm55_vm1, %v596_v8, -inf }
 0x6a9   :  { %v598_v4 = vsel %vm55_vm1, %v594_v3, -inf  ;;  %v597_v6 = vsel %vm1929_vm6, %v593_v62, -1e+30 }
 0x6aa   :  { %599 = vmax.xlane.f32.xlu1 %v598_v4  ;;  %v595_v5 = vsel %vm1925_vm5, %v591_v2, -1e+30  ;;  %v607_v9 = vsel %vm55_vm1, %v597_v6, -inf }
 0x6ab   :  { %v601_v7 = vsel %vm55_vm1, %v595_v5, -inf }
 0x6ac   :  { %602 = vmax.xlane.f32.xlu0 %v601_v7  ;;  %v1735_v7 = vld [vmem:[#allocation2 + $0x50] sm:$0xff]  }
 0x6ad   :  { %1668 = vmatprep.subr.bf16.mxu1 %v1735_v7 }
 0x6ae   :  { %608 = vmax.xlane.f32.xlu1 %v607_v9  ;;  %1669 = vmatpush3.bf16.msra.mxu1 %v1735_v7 }
 0x6b0   :  { %605 = vmax.xlane.f32.xlu0 %v604_v52 }
 0x737   :  { %v600_v10 = vpop.xlane.xlu1 %599 }
 0x738   :  { %v610_v13 = vsub.f32 %v594_v3, %v600_v10 }
 0x739   :  { %v603_v11 = vpop.xlane.xlu0 %602 }
 0x73a   :  { %v611_v12 = vsub.f32 %v595_v5, %v603_v11  ;;  %v614_v18 = vmul.f32 1.442695, %v610_v13 }
 0x73b   :  { %v609_v58 = vpop.xlane.xlu1 %608 }
 0x73c   :  { %v613_v14 = vsub.f32 %v597_v6, %v609_v58  ;;  %v616_v59 = vmul.f32 1.442695, %v611_v12 }
 0x73d   :  { %v606_v15 = vpop.xlane.xlu0 %605 }
 0x73e   :  { %v620_v16 = vmul.f32 1.442695, %v613_v14  ;;  %v612_v17 = vsub.f32 %v596_v8, %v606_v15  ;;  %v1736_v8 = vld [vmem:[#allocation2 + $0x58] sm:$0xff]  }
 0x73f   :  { %1670 = vmatprep.subr.bf16.mxu1 %v1736_v8 }
 0x740   :  { %1759 = vpow2.f32 %v620_v16  ;;  %v618_v0 = vmul.f32 1.442695, %v612_v17  ;;  %1671 = vmatpush3.bf16.msra.mxu1 %v1736_v8  ;;  %v1737_v17 = vld [vmem:[#allocation2 + $0x60] sm:$0xff]  }
 0x741   :  { %1761 = vpow2.f32 %v616_v59 }
 0x742   :  { %1763 = vpow2.f32 %v618_v0  ;;  %v1739_v0 = vld [vmem:[#allocation2 + $0x68] sm:$0xff]  }
 0x743   :  { %1765 = vpow2.f32 %v614_v18  ;;  %v1738_v18 = vld [vmem:[#allocation2 + $0x70] sm:$0xff]  }
 0x744   :  { %1684 = vmatprep.subr.bf16.mxu1 %v1738_v18 }
 0x74a   :  { %v1760_v19 = vpop.eup %1759 }
 0x74b   :  { %v1762_v20 = vpop.eup %1761  ;;  %v631_v21 = vsel %vm55_vm1, %v1760_v19, 0.0 }
 0x74c   :  { %v1764_v22 = vpop.eup %1763  ;;  %632 = vadd.xlane.f32.xlu1 %v631_v21  ;;  %v625_v25 = vsel %vm55_vm1, %v1762_v20, 0.0 }
 0x74d   :  { %v628_v23 = vsel %vm55_vm1, %v1764_v22, 0.0  ;;  %v1766_v24 = vpop.eup %1765 }
 0x74e   :  { %629 = vadd.xlane.f32.xlu0 %v628_v23  ;;  %v622_v26 = vsel %vm55_vm1, %v1766_v24, 0.0 }
 0x750   :  { %626 = vadd.xlane.f32.xlu1 %v625_v25 }
 0x752   :  { %623 = vadd.xlane.f32.xlu0 %v622_v26 }
 0x761   :  { %646 = vrot.lane.b32.xlu1 %v1905_v33, %s1848_s11 }
 0x768   :  { %644 = vrot.lane.b32.xlu0 %v1907_v35, %s1848_s11 }
 0x7d9   :  { %v633_v27 = vpop.xlane.xlu1 %632 }
 0x7db   :  { %v630_v28 = vpop.xlane.xlu0 %629 }
 0x7dc   :  { %1767 = vrcp.f32 %v630_v28 }
 0x7dd   :  { %v627_v29 = vpop.xlane.xlu1 %626 }
 0x7de   :  { %1769 = vrcp.f32 %v627_v29 }
 0x7df   :  { %1771 = vrcp.f32 %v633_v27  ;;  %v624_v30 = vpop.xlane.xlu0 %623 }
 0x7e0   :  { %1773 = vrcp.f32 %v624_v30 }
 0x7e1   :  { %v647_v32 = vpop.permute.xlu1 %646 }
 0x7e3   :  { %v645_v31 = vpop.permute.xlu0 %644 }
 0x7e4   :  { %1652 = vmatprep.subr.bf16.mxu0 %v645_v31 }
 0x7e5   :  { %1653 = vmatpush3.bf16.msra.mxu0 %v645_v31 }
 0x7e6   :  { %1654 = vmatprep.subr.bf16.mxu0 %v647_v32  ;;  %v1768_v34 = vpop.eup %1767 }
 0x7e7   :  { %v640_v38 = vmul.f32 %v1768_v34, %v1764_v22  ;;  %v1532_v22 = vld [vmem:[%s2302_s2 + $0x3] ss:$0 sm:$0xff]  ;;  %v1537_v34 = vld [vmem:[%s2302_s2 + $0x4] ss:$0 sm:$0xff] }
 0x7e8   :  { %v1770_v36 = vpop.eup %1769 }
 0x7e9   :  { %v1772_v37 = vpop.eup %1771  ;;  %1655 = vmatpush3.bf16.msra.mxu0 %v647_v32  ;;  %v639_v39 = vmul.f32 %v1770_v36, %v1762_v20  ;;  %v1741_v20 = vld [vmem:[#allocation2 + $0x80] sm:$0xff]   ;;  %v1742_v32 = vld [vmem:[#allocation2 + $0x88] sm:$0xff]  }
 0x7ea   :  { %v1774_v33 = vpop.eup %1773  ;;  %v641_v40 = vmul.f32 %v1772_v37, %v1760_v19  ;;  %1660 = vmatprep.subr.bf16.mxu0 %v1733_v43  ;;  %v1740_v19 = vld [vmem:[#allocation2 + $0x78] sm:$0xff]   ;;  %v1542_v36 = vld [vmem:[%s2302_s2 + $0x5] ss:$0 sm:$0xff] }
 0x7eb   :  { %v638_v35 = vmul.f32 %v1774_v33, %v1766_v24 }
 0x7ec   :  { %v643_v42 = vpack.c.bf16 %v641_v40, %v640_v38 }
 0x7ed   :  { %v642_v41 = vpack.c.bf16 %v639_v39, %v638_v35 }
 0x7ef   :  { %1656 = vmatprep.mubr.msk.bf16.mxu0 %vm55_vm1, %v642_v41 }
 0x7f0   :  { %1657 = vmatmul.mubr.msk.bf16.vlgmr.msra.gmra.mrb[12].mxu0 %vm55_vm1, %v643_v42 }
 0x7f1   :  { %1661 = vmatpush3.bf16.msra.mxu0 %v1733_v43 }
 0x7f2   :  { %1662 = vmatprep.subr.bf16.mxu0 %v1734_v44 }
 0x7f5   :  { %1663 = vmatpush3.bf16.msra.mxu0 %v1734_v44 }
 0x7f6   :  { %1676 = vmatprep.subr.bf16.mxu0 %v1737_v17 }
 0x8c3   :  { %v1658_v45 = vpop.f32.mrb[12].mxu0 }
 0x8c4   :  { %v690_v46 = vpop.f32.mrb[13].mxu0 }
 0x8c5   :  { %v1659_v47 = vpop.f32.mrb[14].mxu0 }
 0x8c6   :  { %v1720_v48 = vpack.i.bf16 %v1659_v47, %v1658_v45  ;;  %v693_v49 = vpop.f32.mrb[15].mxu0 }
 0x8c7   :  { %v1715_v50 = vpack.i.bf16 %v693_v49, %v690_v46 }
 0x8c8   :  { %1721 = vrot.lane.b32.xlu0 %v1720_v48, %s1849_s12 }
 0x8c9   :  { %1716 = vrot.lane.b32.xlu1 %v1715_v50, %s1849_s12 }
 0x93a   :  { %v1722_v56 = vpop.permute.xlu0 %1721 }
 0x93b   :  { %v1724_v57 = vunpack.i.h.bf16 %v1722_v56  ;;  %v1723_v60 = vunpack.i.l.bf16 %v1722_v56  ;;  %v1717_v61 = vpop.permute.xlu1 %1716 }
 0x93c   :  { %v1719_v62 = vunpack.i.h.bf16 %v1717_v61  ;;  %v1718_v63 = vunpack.i.l.bf16 %v1717_v61 }
 0x93d   :  { %v724_v1 = vsel %vm344_vm3, %v1973_v54, %v1724_v57  ;;  %v723_v2 = vsel %vm344_vm3, %v1969_v51, %v1723_v60  ;;  %v1527_v51 = vld [vmem:[%s2302_s2 + $0x2] ss:$0 sm:$0xff] }
 0x93e   :  { %v726_v3 = vpack.c.bf16 %v724_v1, %v723_v2  ;;  %v722_v4 = vsel %vm344_vm3, %v1975_v55, %v1719_v62  ;;  %v721_v5 = vsel %vm344_vm3, %v1971_v53, %v1718_v63 }
 0x93f   :  { %v725_v6 = vpack.c.bf16 %v722_v4, %v721_v5  ;;  %v1547_v5 = vld [vmem:[%s2302_s2 + $0x6] ss:$0 sm:$0xff] }
 0x941   :  { %1664 = vmatprep.mubr.msk.bf16.mxu0 %vm55_vm1, %v725_v6 }
 0x942   :  { %1665 = vmatmul.mubr.msk.bf16.vlgmr.msra.gmra.mrb[16].mxu0 %vm55_vm1, %v726_v3 }
 0x943   :  { %1677 = vmatpush3.bf16.msra.mxu0 %v1737_v17 }
 0x944   :  { %1678 = vmatprep.subr.bf16.mxu0 %v1739_v0 }
 0x947   :  { %1679 = vmatpush3.bf16.msra.mxu0 %v1739_v0 }
 0x948   :  { %1692 = vmatprep.subr.bf16.mxu0 %v1741_v20 }
 0xa15   :  { %v1666_v54 = vpop.f32.mrb[16].mxu0 }
 0xa16   :  { %v797_v55 = vadd.f32 %v1666_v54, %v1527_v51  ;;  %v788_v9 = vpop.f32.mrb[17].mxu0 }
 0xa17   :  { %v789_v52 = vadd.f32 %v1527_v51, %v788_v9  ;;  %v1667_v53 = vpop.f32.mrb[18].mxu0 }
 0xa18   :  { %v800_v10 = vadd.f32 %v1667_v53, %v1527_v51  ;;  %v791_v11 = vpop.f32.mrb[19].mxu0  ;;  %v805_v58 = vmax.f32 %v797_v55, 0.0 }
 0xa19   :  { %v792_v12 = vadd.f32 %v1527_v51, %v791_v11  ;;  %v803_v14 = vmax.f32 %v789_v52, 0.0 }
 0xa1a   :  { %v806_v13 = vmax.f32 %v800_v10, 0.0 }
 0xa1b   :  { %v804_v59 = vmax.f32 %v792_v12, 0.0 }
 0xa1c   :  { %v808_v15 = vpack.c.bf16 %v806_v13, %v805_v58 }
 0xa1d   :  { %v807_v16 = vpack.c.bf16 %v804_v59, %v803_v14 }
 0xa1f   :  { %1672 = vmatprep.mubr.msk.bf16.mxu1 %vm55_vm1, %v807_v16 }
 0xa20   :  { %1673 = vmatmul.mubr.msk.bf16.vlgmr.msra.gmra.mrb[12].mxu1 %vm55_vm1, %v808_v15 }
 0xa21   :  { %1685 = vmatpush3.bf16.msra.mxu1 %v1738_v18 }
 0xa22   :  { %1686 = vmatprep.subr.bf16.mxu1 %v1740_v19 }
 0xa25   :  { %1687 = vmatpush3.bf16.msra.mxu1 %v1740_v19 }
 0xaf3   :  { %v1674_v21 = vpop.f32.mrb[12].mxu1 }
 0xaf4   :  { %v870_v23 = vpop.f32.mrb[13].mxu1  ;;  %v879_v25 = vadd.f32 %v1674_v21, %v1532_v22 }
 0xaf5   :  { %v1675_v24 = vpop.f32.mrb[14].mxu1  ;;  %v871_v28 = vadd.f32 %v1532_v22, %v870_v23 }
 0xaf6   :  { %v882_v26 = vadd.f32 %v1675_v24, %v1532_v22  ;;  %v873_v27 = vpop.f32.mrb[15].mxu1 }
 0xaf7   :  { %v874_v29 = vadd.f32 %v1532_v22, %v873_v27 }
 0xaf8   :  { %v886_v30 = vpack.c.bf16 %v882_v26, %v879_v25 }
 0xaf9   :  { %v885_v31 = vpack.c.bf16 %v874_v29, %v871_v28 }
 0xafb   :  { %1680 = vmatprep.mubr.msk.bf16.mxu0 %vm55_vm1, %v885_v31  ;;  %1688 = vmatprep.mubr.msk.bf16.mxu1 %vm55_vm1, %v885_v31 }
 0xafc   :  { %1681 = vmatmul.mubr.msk.bf16.vlgmr.msra.gmra.mrb[20].mxu0 %vm55_vm1, %v886_v30  ;;  %1689 = vmatmul.mubr.msk.bf16.vlgmr.msra.gmra.mrb[16].mxu1 %vm55_vm1, %v886_v30 }
 0xafd   :  { %1693 = vmatpush3.bf16.msra.mxu0 %v1741_v20  ;;  %1696 = vmatprep.mubr.msk.bf16.mxu0 %vm55_vm1, %v885_v31 }
 0xafe   :  { %1694 = vmatprep.subr.bf16.mxu0 %v1742_v32 }
 0xb01   :  { %1695 = vmatpush3.bf16.msra.mxu0 %v1742_v32 }
 0xb04   :  { %1697 = vmatmul.mubr.msk.bf16.vlgmr.msra.gmra.mrb[24].mxu0 %vm55_vm1, %v886_v30 }
 0xbcf   :  { %v1682_v37 = vpop.f32.mrb[20].mxu0  ;;  %v1690_v33 = vpop.f32.mrb[16].mxu1 }
 0xbd0   :  { %v2027_v38 = vadd.f32 %v1682_v37, %v1537_v34  ;;  %v1027_v35 = vadd.f32 %v1690_v33, %v1542_v36  ;;  %v948_v39 = vpop.f32.mrb[21].mxu0  ;;  %v1018_v40 = vpop.f32.mrb[17].mxu1 }
 0xbd1   :  { %v2029_v41 = vadd.f32 %v1537_v34, %v948_v39  ;;  %v1019_v42 = vadd.f32 %v1542_v36, %v1018_v40  ;;  %v1683_v43 = vpop.f32.mrb[22].mxu0  ;;  %v1691_v44 = vpop.f32.mrb[18].mxu1 }
 0xbd2   :  { %v1482_v45 = vsel %vm1475_vm8, %v2027_v38, 0.0  ;;  %v1035_v46 = vmax.f32 %v1027_v35, -10.0  ;;  %v2033_v47 = vadd.f32 %v1683_v43, %v1537_v34  ;;  %v1030_v48 = vadd.f32 %v1691_v44, %v1542_v36  ;;  %v951_v49 = vpop.f32.mrb[23].mxu0  ;;  %v1021_v50 = vpop.f32.mrb[19].mxu1 }
 0xbd3   :  { %1495 = vst [vmem:[%s2304_s4 + $0x38] sm:$0xff] %v1482_v45  ;;  %v1480_v56 = vsel %vm1475_vm8, %v2029_v41, 0.0  ;;  %v1033_v57 = vmax.f32 %v1019_v42, -10.0  ;;  %v2040_v60 = vadd.f32 %v1537_v34, %v951_v49  ;;  %v1022_v61 = vadd.f32 %v1542_v36, %v1021_v50 }
 0xbd4   :  { %v2042_v62 = vmin.f32 %v1035_v46, 0.0  ;;  %1489 = vst [vmem:[%s2304_s4 + $0x8] sm:$0xff] %v1480_v56  ;;  %v1483_v63 = vsel %vm1475_vm8, %v2033_v47, 0.0  ;;  %v1036_v1 = vmax.f32 %v1030_v48, -10.0 }
 0xbd5   :  { %v2049_v2 = vmin.f32 %v1033_v57, 0.0  ;;  %1498 = vst [vmem:[%s2304_s4 + $0x50] sm:$0xff] %v1483_v63  ;;  %v1481_v3 = vsel %vm1475_vm8, %v2040_v60, 0.0  ;;  %v1034_v4 = vmax.f32 %v1022_v61, -10.0 }
 0xbd6   :  { %v1486_v6 = vsel %vm1475_vm8, %v2042_v62, 0.0  ;;  %v2061_v7 = vmin.f32 %v1036_v1, 0.0  ;;  %1492 = vst [vmem:[%s2304_s4 + $0x20] sm:$0xff] %v1481_v3 }
 0xbd7   :  { %1496 = vst [vmem:[%s2304_s4 + $0x40] sm:$0xff] %v1486_v6  ;;  %v1484_v8 = vsel %vm1475_vm8, %v2049_v2, 0.0  ;;  %v2071_v51 = vmin.f32 %v1034_v4, 0.0  ;;  %v1698_v54 = vpop.f32.mrb[24].mxu0 }
 0xbd8   :  { %1490 = vst [vmem:[%s2304_s4 + $0x10] sm:$0xff] %v1484_v8  ;;  %v1487_v55 = vsel %vm1475_vm8, %v2061_v7, 0.0  ;;  %v2078_v9 = vadd.f32 %v1698_v54, %v1547_v5  ;;  %v1096_v52 = vpop.f32.mrb[25].mxu0 }
 0xbd9   :  { %1499 = vst [vmem:[%s2304_s4 + $0x58] sm:$0xff] %v1487_v55  ;;  %v1485_v53 = vsel %vm1475_vm8, %v2071_v51, 0.0  ;;  %v1699_v10 = vpop.f32.mrb[26].mxu0  ;;  %v2092_v58 = vadd.f32 %v1547_v5, %v1096_v52 }
 0xbda   :  { %1493 = vst [vmem:[%s2304_s4 + $0x28] sm:$0xff] %v1485_v53  ;;  %v2088_v11 = vadd.f32 %v1699_v10, %v1547_v5  ;;  %1119 = vrot.lane.b32.xlu1 %v2078_v9, %s1845_s8  ;;  %v1099_v12 = vpop.f32.mrb[27].mxu0 }
 0xbdb   :  { %v2096_v13 = vadd.f32 %v1547_v5, %v1099_v12 }
 0xbdc   :  { %1121 = vrot.lane.b32.xlu0 %v2088_v11, %s1845_s8 }
 0xbde   :  { %1115 = vrot.lane.b32.xlu1 %v2092_v58, %s1845_s8 }
 0xbe0   :  { %1117 = vrot.lane.b32.xlu0 %v2096_v13, %s1845_s8 }
 0xbe2   :  { %1131 = vrot.lane.b32.xlu1 %v2092_v58, %s1840_s25 }
 0xbe4   :  { %1133 = vrot.lane.b32.xlu0 %v2096_v13, %s1840_s25 }
 0xbe6   :  { %1135 = vrot.lane.b32.xlu1 %v2078_v9, %s1840_s25 }
 0xbe8   :  { %1137 = vrot.lane.b32.xlu0 %v2088_v11, %s1840_s25 }
 0xc4c   :  { %v1120_v14 = vpop.permute.xlu1 %1119 }
 0xc4d   :  { %v1129_v0 = vmax.f32 %v2078_v9, %v1120_v14 }
 0xc4e   :  { %v1122_v59 = vpop.permute.xlu0 %1121 }
 0xc4f   :  { %v1130_v20 = vmax.f32 %v2088_v11, %v1122_v59 }
 0xc50   :  { %v1116_v15 = vpop.permute.xlu1 %1115 }
 0xc51   :  { %v1127_v23 = vmax.f32 %v2092_v58, %v1116_v15 }
 0xc52   :  { %v1118_v16 = vpop.permute.xlu0 %1117 }
 0xc53   :  { %v1128_v25 = vmax.f32 %v2096_v13, %v1118_v16 }
 0xc54   :  { %v1132_v17 = vpop.permute.xlu1 %1131 }
 0xc55   :  { %v1143_v26 = vmax.f32 %v1127_v23, %v1132_v17 }
 0xc56   :  { %v1134_v18 = vpop.permute.xlu0 %1133 }
 0xc57   :  { %v1144_v27 = vmax.f32 %v1128_v25, %v1134_v18  ;;  %v1147_v52 = vsub.f32 %v2092_v58, %v1143_v26 }
 0xc58   :  { %v1136_v19 = vpop.permute.xlu1 %1135 }
 0xc59   :  { %v2112_v21 = vmax.f32 %v1129_v0, %v1136_v19  ;;  %v1148_v53 = vsub.f32 %v2096_v13, %v1144_v27  ;;  %v1151_v10 = vmul.f32 1.442695, %v1147_v52 }
 0xc5a   :  { %v1138_v22 = vpop.permute.xlu0 %1137 }
 0xc5b   :  { %v2115_v24 = vmax.f32 %v1130_v20, %v1138_v22  ;;  %1167 = vrot.lane.b32.xlu1 %v2112_v21, %s1844_s7  ;;  %v1149_v12 = vsub.f32 %v2078_v9, %v2112_v21  ;;  %v1153_v14 = vmul.f32 1.442695, %v1148_v53 }
 0xc5d   :  { %1169 = vrot.lane.b32.xlu0 %v2115_v24, %s1844_s7  ;;  %v1150_v59 = vsub.f32 %v2088_v11, %v2115_v24  ;;  %v1155_v15 = vmul.f32 1.442695, %v1149_v12 }
 0xc5f   :  { %1163 = vrot.lane.b32.xlu1 %v1143_v26, %s1844_s7  ;;  %v1157_v16 = vmul.f32 1.442695, %v1150_v59 }
 0xc61   :  { %1165 = vrot.lane.b32.xlu0 %v1144_v27, %s1844_s7 }
 0xc63   :  { %1187 = vrot.lane.b32.xlu1 %v1143_v26, %s1840_s25 }
 0xc65   :  { %1189 = vrot.lane.b32.xlu0 %v1144_v27, %s1840_s25 }
 0xc67   :  { %1191 = vrot.lane.b32.xlu1 %v2112_v21, %s1840_s25 }
 0xc69   :  { %1193 = vrot.lane.b32.xlu0 %v2115_v24, %s1840_s25 }
 0xccd   :  { %v1168_v28 = vpop.permute.xlu1 %1167 }
 0xcce   :  { %v1177_v29 = vsub.f32 %v2078_v9, %v1168_v28 }
 0xccf   :  { %v1170_v30 = vpop.permute.xlu0 %1169 }
 0xcd0   :  { %v1183_v31 = vmul.f32 1.442695, %v1177_v29  ;;  %v1178_v32 = vsub.f32 %v2088_v11, %v1170_v30 }
 0xcd1   :  { %v1164_v34 = vpop.permute.xlu1 %1163 }
 0xcd2   :  { %1775 = vpow2.f32 %v1183_v31  ;;  %v1185_v36 = vmul.f32 1.442695, %v1178_v32  ;;  %v1175_v37 = vsub.f32 %v2092_v58, %v1164_v34 }
 0xcd3   :  { %v1166_v33 = vpop.permute.xlu0 %1165 }
 0xcd4   :  { %1777 = vpow2.f32 %v1185_v36  ;;  %v1179_v35 = vmul.f32 1.442695, %v1175_v37  ;;  %v1176_v39 = vsub.f32 %v2096_v13, %v1166_v33 }
 0xcd5   :  { %v1188_v40 = vpop.permute.xlu1 %1187 }
 0xcd6   :  { %1779 = vpow2.f32 %v1179_v35  ;;  %v1181_v42 = vmul.f32 1.442695, %v1176_v39  ;;  %v1199_v43 = vsub.f32 %v2092_v58, %v1188_v40 }
 0xcd7   :  { %v1190_v44 = vpop.permute.xlu0 %1189 }
 0xcd8   :  { %1781 = vpow2.f32 %v1181_v42  ;;  %v1203_v45 = vmul.f32 1.442695, %v1199_v43  ;;  %v1200_v46 = vsub.f32 %v2096_v13, %v1190_v44 }
 0xcd9   :  { %v1192_v48 = vpop.permute.xlu1 %1191 }
 0xcda   :  { %1783 = vpow2.f32 %v1203_v45  ;;  %v1205_v49 = vmul.f32 1.442695, %v1200_v46  ;;  %v1201_v50 = vsub.f32 %v2078_v9, %v1192_v48 }
 0xcdb   :  { %v1194_v56 = vpop.permute.xlu0 %1193 }
 0xcdc   :  { %v2137_v57 = vpop.eup %1775  ;;  %1785 = vpow2.f32 %v1205_v49  ;;  %v1207_v61 = vmul.f32 1.442695, %v1201_v50  ;;  %v1202_v63 = vsub.f32 %v2088_v11, %v1194_v56 }
 0xcdd   :  { %1219 = vrot.lane.b32.xlu1 %v2137_v57, %s1845_s8 }
 0xcde   :  { %v2142_v1 = vpop.eup %1777  ;;  %1787 = vpow2.f32 %v1207_v61  ;;  %v1209_v3 = vmul.f32 1.442695, %v1202_v63 }
 0xcdf   :  { %1221 = vrot.lane.b32.xlu0 %v2142_v1, %s1845_s8 }
 0xce0   :  { %v2146_v4 = vpop.eup %1779  ;;  %1789 = vpow2.f32 %v1209_v3 }
 0xce1   :  { %1215 = vrot.lane.b32.xlu1 %v2146_v4, %s1845_s8  ;;  %1791 = vpow2.f32 %v1151_v10 }
 0xce2   :  { %v2150_v5 = vpop.eup %1781  ;;  %1793 = vpow2.f32 %v1153_v14 }
 0xce3   :  { %1217 = vrot.lane.b32.xlu0 %v2150_v5, %s1845_s8  ;;  %1795 = vpow2.f32 %v1155_v15 }
 0xce4   :  { %v2154_v6 = vpop.eup %1783  ;;  %1797 = vpow2.f32 %v1157_v16 }
 0xce5   :  { %1235 = vrot.lane.b32.xlu1 %v2154_v6, %s1840_s25 }
 0xce6   :  { %v2158_v8 = vpop.eup %1785 }
 0xce7   :  { %1237 = vrot.lane.b32.xlu0 %v2158_v8, %s1840_s25 }
 0xce8   :  { %v2162_v54 = vpop.eup %1787 }
 0xce9   :  { %1239 = vrot.lane.b32.xlu1 %v2162_v54, %s1840_s25 }
 0xcea   :  { %v2166_v55 = vpop.eup %1789 }
 0xceb   :  { %1241 = vrot.lane.b32.xlu0 %v2166_v55, %s1840_s25  ;;  %v1792_v58 = vpop.eup %1791 }
 0xcec   :  { %v1794_v20 = vpop.eup %1793 }
 0xced   :  { %v1796_v21 = vpop.eup %1795 }
 0xcee   :  { %v1798_v24 = vpop.eup %1797 }
 0xd4f   :  { %v1220_v17 = vpop.permute.xlu1 %1219 }
 0xd50   :  { %v1229_v26 = vadd.f32 %v1796_v21, %v1220_v17 }
 0xd51   :  { %v1222_v18 = vpop.permute.xlu0 %1221 }
 0xd52   :  { %v1230_v28 = vadd.f32 %v1798_v24, %v1222_v18 }
 0xd53   :  { %v1216_v0 = vpop.permute.xlu1 %1215 }
 0xd54   :  { %v1227_v13 = vadd.f32 %v1792_v58, %v1216_v0 }
 0xd55   :  { %v1218_v19 = vpop.permute.xlu0 %1217 }
 0xd56   :  { %v1228_v23 = vadd.f32 %v1794_v20, %v1218_v19 }
 0xd57   :  { %v1236_v22 = vpop.permute.xlu1 %1235 }
 0xd58   :  { %v1247_v9 = vadd.f32 %v1236_v22, %v1227_v13 }
 0xd59   :  { %v1238_v25 = vpop.permute.xlu0 %1237 }
 0xd5a   :  { %1799 = vrcp.f32 %v1247_v9  ;;  %v1248_v11 = vadd.f32 %v1238_v25, %v1228_v23 }
 0xd5b   :  { %v1240_v27 = vpop.permute.xlu1 %1239 }
 0xd5c   :  { %1801 = vrcp.f32 %v1248_v11  ;;  %v1249_v29 = vadd.f32 %v1240_v27, %v1229_v26 }
 0xd5d   :  { %v1242_v30 = vpop.permute.xlu0 %1241 }
 0xd5e   :  { %1803 = vrcp.f32 %v1249_v29  ;;  %v1250_v31 = vadd.f32 %v1242_v30, %v1230_v28 }
 0xd60   :  { %1805 = vrcp.f32 %v1250_v31 }
 0xd64   :  { %v1800_v32 = vpop.eup %1799 }
 0xd65   :  { %v2176_v34 = vmul.f32 %v1800_v32, %v1792_v58 }
 0xd66   :  { %v1802_v36 = vpop.eup %1801 }
 0xd67   :  { %v2178_v37 = vmul.f32 %v1802_v36, %v1794_v20  ;;  %v1263_v30 = vmul.f32 %v2176_v34, %v2029_v41 }
 0xd68   :  { %v1804_v33 = vpop.eup %1803 }
 0xd69   :  { %1287 = vrot.lane.b32.xlu1 %v1804_v33, %s1844_s7  ;;  %v2181_v35 = vmul.f32 %v1804_v33, %v1796_v21 }
 0xd6a   :  { %v1806_v39 = vpop.eup %1805 }
 0xd6b   :  { %1289 = vrot.lane.b32.xlu0 %v1806_v39, %s1844_s7  ;;  %v2184_v40 = vmul.f32 %v1806_v39, %v1798_v24  ;;  %v1265_v22 = vmul.f32 %v2181_v35, %v2027_v38 }
 0xd6d   :  { %1283 = vrot.lane.b32.xlu1 %v1800_v32, %s1844_s7  ;;  %v1266_v21 = vmul.f32 %v2184_v40, %v2033_v47 }
 0xd6f   :  { %1285 = vrot.lane.b32.xlu0 %v1802_v36, %s1844_s7 }
 0xd71   :  { %1347 = vrot.lane.b32.xlu1 %v1800_v32, %s1840_s25  ;;  %v1264_v32 = vmul.f32 %v2178_v37, %v2040_v60 }
 0xd73   :  { %1349 = vrot.lane.b32.xlu0 %v1802_v36, %s1840_s25 }
 0xd75   :  { %1351 = vrot.lane.b32.xlu1 %v1804_v33, %s1840_s25 }
 0xd77   :  { %1353 = vrot.lane.b32.xlu0 %v1806_v39, %s1840_s25  ;;  %v1271_v39 = vmul.f32 %v2176_v34, %v2049_v2 }
 0xddb   :  { %v1288_v42 = vpop.permute.xlu1 %1287 }
 0xddc   :  { %v1297_v43 = vmul.f32 %v2137_v57, %v1288_v42 }
 0xddd   :  { %v1290_v44 = vpop.permute.xlu0 %1289 }
 0xdde   :  { %v1301_v45 = vmul.f32 %v1297_v43, %v2027_v38  ;;  %v1298_v46 = vmul.f32 %v2142_v1, %v1290_v44  ;;  %v1325_v56 = vmul.f32 %v1297_v43, %v2042_v62 }
 0xddf   :  { %v1284_v48 = vpop.permute.xlu1 %1283 }
 0xde0   :  { %v1302_v49 = vmul.f32 %v1298_v46, %v2033_v47  ;;  %1311 = vrot.lane.b32.xlu1 %v1301_v45, %s1845_s8  ;;  %v1326_v63 = vmul.f32 %v1298_v46, %v2061_v7  ;;  %v1295_v53 = vmul.f32 %v2146_v4, %v1284_v48  ;;  %v1272_v45 = vmul.f32 %v2178_v37, %v2071_v51 }
 0xde1   :  { %v1286_v50 = vpop.permute.xlu0 %1285  ;;  %v1273_v48 = vmul.f32 %v2181_v35, %v2042_v62 }
 0xde2   :  { %1313 = vrot.lane.b32.xlu0 %v1302_v49, %s1845_s8  ;;  %v1296_v14 = vmul.f32 %v2150_v5, %v1286_v50  ;;  %v1299_v15 = vmul.f32 %v1295_v53, %v2029_v41  ;;  %v1323_v4 = vmul.f32 %v1295_v53, %v2049_v2 }
 0xde3   :  { %v1348_v61 = vpop.permute.xlu1 %1347 }
 0xde4   :  { %1335 = vrot.lane.b32.xlu1 %v1325_v56, %s1845_s8  ;;  %v1300_v16 = vmul.f32 %v1296_v14, %v2040_v60  ;;  %v1324_v5 = vmul.f32 %v1296_v14, %v2071_v51  ;;  %v1424_v14 = vld [vmem:[%s2303_s3 + $0x8] sm:$0xff] }
 0xde5   :  { %v1350_v57 = vpop.permute.xlu0 %1349 }
 0xde6   :  { %1337 = vrot.lane.b32.xlu0 %v1326_v63, %s1845_s8 }
 0xde7   :  { %v1352_v3 = vpop.permute.xlu1 %1351 }
 0xde8   :  { %v1361_v1 = vmul.f32 %v2162_v54, %v1352_v3  ;;  %v1359_v54 = vmul.f32 %v2154_v6, %v1348_v61 }
 0xde9   :  { %v1354_v52 = vpop.permute.xlu0 %1353 }
 0xdea   :  { %v1362_v10 = vmul.f32 %v2166_v55, %v1354_v52  ;;  %v1365_v12 = vmul.f32 %v1361_v1, %v2027_v38  ;;  %v1360_v55 = vmul.f32 %v2158_v8, %v1350_v57  ;;  %v1363_v17 = vmul.f32 %v1359_v54, %v2029_v41 }
 0xdeb   :  { %v1387_v6 = vmul.f32 %v1359_v54, %v2049_v2  ;;  %v1389_v8 = vmul.f32 %v1361_v1, %v2042_v62  ;;  %v1274_v2 = vmul.f32 %v2184_v40, %v2061_v7 }
 0xdec   :  { %1375 = vrot.lane.b32.xlu1 %v1365_v12, %s1840_s25  ;;  %v1366_v59 = vmul.f32 %v1362_v10, %v2033_v47  ;;  %v1364_v18 = vmul.f32 %v1360_v55, %v2040_v60  ;;  %v1388_v0 = vmul.f32 %v1360_v55, %v2071_v51  ;;  %v1390_v58 = vmul.f32 %v1362_v10, %v2061_v7  ;;  %v1423_v10 = vld [vmem:[%s2303_s3] sm:$0xff]  ;;  %v1426_v55 = vld [vmem:[%s2303_s3 + $0x18] sm:$0xff] }
 0xdee   :  { %1377 = vrot.lane.b32.xlu0 %v1366_v59, %s1840_s25 }
 0xdf0   :  { %1307 = vrot.lane.b32.xlu1 %v1299_v15, %s1845_s8 }
 0xdf2   :  { %1309 = vrot.lane.b32.xlu0 %v1300_v16, %s1845_s8  ;;  %v1425_v16 = vld [vmem:[%s2303_s3 + $0x10] sm:$0xff] }
 0xdf4   :  { %1331 = vrot.lane.b32.xlu1 %v1323_v4, %s1845_s8 }
 0xdf6   :  { %1333 = vrot.lane.b32.xlu0 %v1324_v5, %s1845_s8 }
 0xdf8   :  { %1371 = vrot.lane.b32.xlu1 %v1363_v17, %s1840_s25 }
 0xdfa   :  { %1373 = vrot.lane.b32.xlu0 %v1364_v18, %s1840_s25 }
 0xdfc   :  { %1395 = vrot.lane.b32.xlu1 %v1387_v6, %s1840_s25 }
 0xdfe   :  { %1397 = vrot.lane.b32.xlu0 %v1388_v0, %s1840_s25 }
 0xe00   :  { %1399 = vrot.lane.b32.xlu1 %v1389_v8, %s1840_s25 }
 0xe02   :  { %1401 = vrot.lane.b32.xlu0 %v1390_v58, %s1840_s25 }
 0xe52   :  { %v1312_v19 = vpop.permute.xlu1 %1311 }
 0xe53   :  { %v1321_v9 = vadd.f32 %v1312_v19, %v1265_v22 }
 0xe54   :  { %v1314_v13 = vpop.permute.xlu0 %1313 }
 0xe55   :  { %v1322_v26 = vadd.f32 %v1314_v13, %v1266_v21 }
 0xe56   :  { %v1336_v20 = vpop.permute.xlu1 %1335 }
 0xe57   :  { %v1345_v56 = vadd.f32 %v1336_v20, %v1273_v48 }
 0xe58   :  { %v1338_v23 = vpop.permute.xlu0 %1337 }
 0xe59   :  { %v1346_v37 = vadd.f32 %v1338_v23, %v1274_v2 }
 0xe5e   :  { %v1376_v25 = vpop.permute.xlu1 %1375 }
 0xe5f   :  { %v2236_v11 = vadd.f32 %v1376_v25, %v1321_v9 }
 0xe60   :  { %v1378_v24 = vpop.permute.xlu0 %1377 }
 0xe61   :  { %v2238_v27 = vadd.f32 %v1378_v24, %v1322_v26  ;;  %1443 = vrot.lane.b32.xlu1 %v2236_v11, %s1844_s7 }
 0xe62   :  { %v1308_v28 = vpop.permute.xlu1 %1307 }
 0xe63   :  { %1445 = vrot.lane.b32.xlu0 %v2238_v27, %s1844_s7  ;;  %v1319_v31 = vadd.f32 %v1308_v28, %v1263_v30 }
 0xe64   :  { %v1310_v38 = vpop.permute.xlu0 %1309 }
 0xe65   :  { %v1320_v33 = vadd.f32 %v1310_v38, %v1264_v32 }
 0xe66   :  { %v1332_v29 = vpop.permute.xlu1 %1331 }
 0xe67   :  { %v1343_v44 = vadd.f32 %v1332_v29, %v1271_v39 }
 0xe68   :  { %v1334_v47 = vpop.permute.xlu0 %1333 }
 0xe69   :  { %v1344_v49 = vadd.f32 %v1334_v47, %v1272_v45 }
 0xe6a   :  { %v1372_v36 = vpop.permute.xlu1 %1371 }
 0xe6b   :  { %v1383_v42 = vadd.f32 %v1372_v36, %v1319_v31 }
 0xe6c   :  { %v1374_v43 = vpop.permute.xlu0 %1373 }
 0xe6d   :  { %v1384_v46 = vadd.f32 %v1374_v43, %v1320_v33  ;;  %1439 = vrot.lane.b32.xlu1 %v1383_v42, %s1844_s7 }
 0xe6e   :  { %v1396_v41 = vpop.permute.xlu1 %1395 }
 0xe6f   :  { %v1407_v60 = vadd.f32 %v1396_v41, %v1343_v44  ;;  %1441 = vrot.lane.b32.xlu0 %v1384_v46, %s1844_s7 }
 0xe70   :  { %v1398_v50 = vpop.permute.xlu0 %1397 }
 0xe71   :  { %v1411_v34 = vmul.f32 0.5, %v1407_v60  ;;  %v1408_v61 = vadd.f32 %v1398_v50, %v1344_v49  ;;  %1455 = vrot.lane.b32.xlu1 %v1407_v60, %s1840_s25 }
 0xe72   :  { %v1400_v51 = vpop.permute.xlu1 %1399 }
 0xe73   :  { %v1415_v63 = vmul.f32 1.442695, %v1411_v34  ;;  %v1412_v57 = vmul.f32 0.5, %v1408_v61  ;;  %v1409_v3 = vadd.f32 %v1400_v51, %v1345_v56  ;;  %1457 = vrot.lane.b32.xlu0 %v1408_v61, %s1840_s25 }
 0xe74   :  { %v1402_v62 = vpop.permute.xlu0 %1401 }
 0xe75   :  { %1807 = vpow2.f32 %v1415_v63  ;;  %v1417_v35 = vmul.f32 1.442695, %v1412_v57  ;;  %v1413_v1 = vmul.f32 0.5, %v1409_v3  ;;  %v1410_v52 = vadd.f32 %v1402_v62, %v1346_v37  ;;  %1459 = vrot.lane.b32.xlu1 %v1409_v3, %s1840_s25 }
 0xe77   :  { %1809 = vpow2.f32 %v1417_v35  ;;  %v1419_v7 = vmul.f32 1.442695, %v1413_v1  ;;  %v1414_v40 = vmul.f32 0.5, %v1410_v52  ;;  %1461 = vrot.lane.b32.xlu0 %v1410_v52, %s1840_s25 }
 0xe79   :  { %1811 = vpow2.f32 %v1419_v7  ;;  %v1421_v53 = vmul.f32 1.442695, %v1414_v40 }
 0xe7b   :  { %1813 = vpow2.f32 %v1421_v53 }
 0xe7f   :  { %v1808_v12 = vpop.eup %1807 }
 0xe80   :  { %v1427_v59 = vmul.f32 %v1808_v12, %v1423_v10 }
 0xe81   :  { %v1810_v15 = vpop.eup %1809 }
 0xe82   :  { %v1431_v4 = vadd.f32 %v1427_v59, %v1383_v42  ;;  %v1428_v54 = vmul.f32 %v1810_v15, %v1424_v14 }
 0xe83   :  { %v1812_v5 = vpop.eup %1811 }
 0xe84   :  { %v1429_v17 = vmul.f32 %v1812_v5, %v1425_v16  ;;  %v1432_v18 = vadd.f32 %v1428_v54, %v1384_v46 }
 0xe85   :  { %v1814_v6 = vpop.eup %1813 }
 0xe86   :  { %v1433_v0 = vadd.f32 %v1429_v17, %v2236_v11  ;;  %v1430_v8 = vmul.f32 %v1814_v6, %v1426_v55 }
 0xe88   :  { %v1434_v58 = vadd.f32 %v1430_v8, %v2238_v27 }
 0xed3   :  { %v1444_v19 = vpop.permute.xlu1 %1443 }
 0xed4   :  { %v1469_v27 = vsel %vm55_vm1, %v1433_v0, %v1444_v19 }
 0xed5   :  { %v1446_v13 = vpop.permute.xlu0 %1445 }
 0xed6   :  { %v1470_v30 = vsel %vm55_vm1, %v1434_v58, %v1446_v13 }
 0xedf   :  { %v1440_v20 = vpop.permute.xlu1 %1439 }
 0xee0   :  { %v1467_v23 = vsel %vm55_vm1, %v1431_v4, %v1440_v20 }
 0xee1   :  { %v1442_v22 = vpop.permute.xlu0 %1441 }
 0xee2   :  { %v1468_v25 = vsel %vm55_vm1, %v1432_v18, %v1442_v22 }
 0xee3   :  { %v1456_v9 = vpop.permute.xlu1 %1455 }
 0xee4   :  { %v1471_v21 = vsel %vm138_vm2, %v1467_v23, %v1456_v9 }
 0xee5   :  { %v1476_v26 = vsel %vm1475_vm8, %v1471_v21, 0.0  ;;  %v1458_v24 = vpop.permute.xlu0 %1457 }
 0xee6   :  { %1488 = vst [vmem:[%s2304_s4] sm:$0xff] %v1476_v26  ;;  %v1472_v11 = vsel %vm138_vm2, %v1468_v25, %v1458_v24 }
 0xee7   :  { %v1477_v28 = vsel %vm1475_vm8, %v1472_v11, 0.0  ;;  %v1460_v38 = vpop.permute.xlu1 %1459 }
 0xee8   :  { %1491 = vst [vmem:[%s2304_s4 + $0x18] sm:$0xff] %v1477_v28  ;;  %v1473_v29 = vsel %vm138_vm2, %v1469_v27, %v1460_v38 }
 0xee9   :  { %v1478_v47 = vsel %vm1475_vm8, %v1473_v29, 0.0  ;;  %v1462_v31 = vpop.permute.xlu0 %1461 }
 0xeea   :  { %1494 = vst [vmem:[%s2304_s4 + $0x30] sm:$0xff] %v1478_v47  ;;  %v1474_v32 = vsel %vm138_vm2, %v1470_v30, %v1462_v31 }
 0xeeb   :  { %v1479_v36 = vsel %vm1475_vm8, %v1474_v32, 0.0 }
 0xeec   :  { %1497 = vst [vmem:[%s2304_s4 + $0x48] sm:$0xff] %v1479_v36 }
 0xeed   :  { %1504 = vsyncpa [#allocation3], 1 }

</bundles_post_ra>
